<compile_context>
chip_gen: v7x
topology: tpu7x:2x2x1
jax: 0.10.0
libtpu: 0.0.40
codegen_flags: <defaults>
</compile_context>

<pallas_src>
import functools
import math

import jax
import jax.numpy as jnp
from jax.experimental import pallas as pl
from jax.experimental.pallas import tpu as pltpu

LN_EPS = 1e-5            # XLM-R / BERT layer_norm_eps default
PAD_TOKEN_ID = 1         # BertSentenceEmbDSSM.pad_token_id
MASK_BIAS = -1e9         # additive attention bias for padded keys (kept f32)


# ----------------------------- kernel helpers --------------------------------

def _layer_norm(x, gamma, beta, eps=LN_EPS):
    mean = jnp.mean(x, axis=-1, keepdims=True)
    var = jnp.mean((x - mean) ** 2, axis=-1, keepdims=True)
    return (x - mean) * jax.lax.rsqrt(var + eps) * gamma + beta


# ----------------------------- fused Pallas kernel ----------------------------

def fused_encoder_kernel(emb_ref, mb_ref, eg_ref, eb_ref,
                         wqkv_ref, bqkv_ref,
                         wo_ref, bo_ref, g1_ref, b1_ref,
                         wi_ref, bi_ref, wd_ref, bd_ref, g2_ref, b2_ref,
                         wp_ref, bp_ref,
                         out_ref,
                         h_ref,
                         *, num_heads, head_dim):
    """Grid step = (batch_block b, layer l): run encoder layer l on batch block b."""
    layer = pl.program_id(1)
    num_layers = pl.num_programs(1)
    Bt, S, H = emb_ref.shape
    M = Bt * S

    # ---- step l == 0: fused embedding LayerNorm into the hidden-state scratch ----
    @pl.when(layer == 0)
    def _init():
        e = emb_ref[...].reshape(M, H)
        h_ref[...] = _layer_norm(e, eg_ref[...], eb_ref[...])

    x = h_ref[...]                                  # [M, H] f32, carried across layers
    xb = x.astype(jnp.bfloat16)

    # Fused QKV projection: bf16 operands, f32 accumulation.  Attention scale is
    # pre-folded into the W_q / b_q portion of the fused weight at packing time.
    qkv = jnp.dot(xb, wqkv_ref[...], preferred_element_type=jnp.float32) + bqkv_ref[...]

    mb = mb_ref[...][:, None, :]                    # [Bt, 1, S] key bias, hoisted

    # TODO(synk): Mosaic dot_general has no multi-batch-dim path, so heads cannot be
    # batched into a single 'bhqd,bhkd->bhqk' einsum; they stay a small static unroll
    # (activation-only matmuls, run with bf16 operands / f32 accumulation).
    ctx_heads = []
    for n in range(num_heads):
        lo = n * head_dim
        qh = qkv[:, lo:lo + head_dim].reshape(Bt, S, head_dim).astype(jnp.bfloat16)
        kh = qkv[:, H + lo:H + lo + head_dim].reshape(Bt, S, head_dim).astype(jnp.bfloat16)
        vh = qkv[:, 2 * H + lo:2 * H + lo + head_dim].reshape(Bt, S, head_dim).astype(jnp.bfloat16)
        s = jnp.einsum('bqd,bkd->bqk', qh, kh, preferred_element_type=jnp.float32)
        s = s + mb
        s = s - jnp.max(s, axis=-1, keepdims=True)
        p = jnp.exp(s)
        p = p * pl.reciprocal(jnp.sum(p, axis=-1, keepdims=True), approx=True)
        ctx_heads.append(jnp.einsum('bqk,bkd->bqd', p.astype(jnp.bfloat16), vh,
                                    preferred_element_type=jnp.float32))
    ctx = jnp.concatenate(ctx_heads, axis=-1).reshape(M, H)

    attn = jnp.dot(ctx.astype(jnp.bfloat16), wo_ref[...],
                   preferred_element_type=jnp.float32) + bo_ref[...]
    h1 = _layer_norm(attn + x, g1_ref[...], b1_ref[...])

    # TODO(synk): HF XLM-R uses exact (erf) GELU; tanh approximation kept for Mosaic lowering.
    ff = jax.nn.gelu(jnp.dot(h1.astype(jnp.bfloat16), wi_ref[...],
                             preferred_element_type=jnp.float32) + bi_ref[...],
                     approximate=True)
    ffo = jnp.dot(ff.astype(jnp.bfloat16), wd_ref[...],
                  preferred_element_type=jnp.float32) + bd_ref[...]
    h_new = _layer_norm(ffo + h1, g2_ref[...], b2_ref[...])
    h_ref[...] = h_new

    # ---- last step: CLS pooling (x[:, 0]) + head projection + L2-normalize ----
    @pl.when(layer == num_layers - 1)
    def _final():
        cls = h_new.reshape(Bt, S, H)[:, 0:1, :].reshape(Bt, H)     # x[:, 0]
        y = jnp.dot(cls.astype(jnp.bfloat16), wp_ref[...],
                    preferred_element_type=jnp.float32) + bp_ref[...]
        ss = jnp.sum(y * y, axis=-1, keepdims=True)                 # padded cols are 0
        out_ref[...] = y * jax.lax.rsqrt(jnp.maximum(ss, 1e-24))    # F.normalize(p=2)


# ----------------------------- pallas_call wrapper -----------------------------

def fused_encoder(packed, emb, mask_bias, *, num_heads, head_dim, batch_block=None):
    B, S, H = emb.shape
    L = packed['wqkv'].shape[0]
    I = packed['wi'].shape[2]
    Pp = packed['wp'].shape[1]                      # lane-padded projection width

    Bt = B if batch_block is None else batch_block  # if Bt < B, use a multiple of 8
    assert B % Bt == 0
    nb = B // Bt

    def _const(shape):
        nd = len(shape)
        return pl.BlockSpec(shape, lambda b, l: (0,) * nd)

    def _layer_param(shape):
        nd = len(shape)
        return pl.BlockSpec((None, *shape), lambda b, l: (l,) + (0,) * nd)

    in_specs = [
        pl.BlockSpec((Bt, S, H), lambda b, l: (b, 0, 0)),     # summed embeddings
        pl.BlockSpec((Bt, S), lambda b, l: (b, 0)),           # additive attention mask bias
        _const((1, H)), _const((1, H)),                       # embedding LN gamma/beta
        _layer_param((H, 3 * H)), _layer_param((1, 3 * H)),   # fused wqkv, bqkv (scale folded)
        _layer_param((H, H)), _layer_param((1, H)),           # wo, bo
        _layer_param((1, H)), _layer_param((1, H)),           # ln1 gamma/beta
        _layer_param((H, I)), _layer_param((1, I)),           # wi, bi
        _layer_param((I, H)), _layer_param((1, H)),           # wd, bd
        _layer_param((1, H)), _layer_param((1, H)),           # ln2 gamma/beta
        _const((H, Pp)), _const((1, Pp)),                     # head projection (padded)
    ]

    kern = functools.partial(fused_encoder_kernel,
                             num_heads=num_heads, head_dim=head_dim)
    return pl.pallas_call(
        kern,
        out_shape=jax.ShapeDtypeStruct((B, Pp), jnp.float32),
        grid_spec=pltpu.PrefetchScalarGridSpec(
            num_scalar_prefetch=0,
            grid=(nb, L),
            in_specs=in_specs,
            out_specs=pl.BlockSpec((Bt, Pp), lambda b, l: (b, 0)),
            scratch_shapes=[pltpu.VMEM((Bt * S, H), jnp.float32)],   # hidden-state carry
        ),
        compiler_params=pltpu.CompilerParams(
            dimension_semantics=("parallel", "arbitrary"),
            vmem_limit_bytes=48 * 1024 * 1024,      # stays under v7x's 64 MiB physical VMEM
        ),
    )(emb, mask_bias, packed['emb_ln_g'], packed['emb_ln_b'],
      packed['wqkv'], packed['bqkv'],
      packed['wo'], packed['bo'],
      packed['ln1_g'], packed['ln1_b'],
      packed['wi'], packed['bi'], packed['wd'], packed['bd'],
      packed['ln2_g'], packed['ln2_b'],
      packed['wp'], packed['bp'])


# ----------------------------- parameters & forward ----------------------------

def init_params(key, *, vocab_size, max_pos, type_vocab, hidden,
                num_layers, intermediate, proj_size):
    keys = iter(jax.random.split(key, 16 * num_layers + 16))

    def nrm(shape):
        return 0.02 * jax.random.normal(next(keys), shape, jnp.float32)

    params = {
        'word_emb': nrm((vocab_size, hidden)).at[PAD_TOKEN_ID].set(0.0),
        'pos_emb': nrm((max_pos, hidden)),
        'type_emb': nrm((type_vocab, hidden)),
        'emb_ln_g': jnp.ones((1, hidden), jnp.float32),
        'emb_ln_b': jnp.zeros((1, hidden), jnp.float32),
        'proj_w': nrm((hidden, proj_size)),
        'proj_b': jnp.zeros((1, proj_size), jnp.float32),
        'layers': [],
    }
    for _ in range(num_layers):
        params['layers'].append({
            'wq': nrm((hidden, hidden)), 'bq': jnp.zeros((1, hidden), jnp.float32),
            'wk': nrm((hidden, hidden)), 'bk': jnp.zeros((1, hidden), jnp.float32),
            'wv': nrm((hidden, hidden)), 'bv': jnp.zeros((1, hidden), jnp.float32),
            'wo': nrm((hidden, hidden)), 'bo': jnp.zeros((1, hidden), jnp.float32),
            'ln1_g': jnp.ones((1, hidden), jnp.float32),
            'ln1_b': jnp.zeros((1, hidden), jnp.float32),
            'wi': nrm((hidden, intermediate)), 'bi': jnp.zeros((1, intermediate), jnp.float32),
            'wd': nrm((intermediate, hidden)), 'bd': jnp.zeros((1, hidden), jnp.float32),
            'ln2_g': jnp.ones((1, hidden), jnp.float32),
            'ln2_b': jnp.zeros((1, hidden), jnp.float32),
        })
    return params


def pack_params(params, *, head_dim):
    """Stack per-layer weights into [L, ...] (bf16 for MXU operands), fuse Q/K/V into one
    [H, 3H] weight, fold the attention scale into the W_q/b_q portion, and pad the head
    projection to a 128-lane output slab."""
    hidden = params['word_emb'].shape[1]
    proj_size = params['proj_w'].shape[1]
    scale = 1.0 / math.sqrt(head_dim)

    def stack(name):
        return jnp.stack([lp[name] for lp in params['layers']], axis=0)

    def stack_w(name):
        return stack(name).astype(jnp.bfloat16)

    # fused QKV with scale folded into the Q third
    wqkv = jnp.concatenate([stack('wq') * scale, stack('wk'), stack('wv')], axis=-1)
    bqkv = jnp.concatenate([stack('bq') * scale, stack('bk'), stack('bv')], axis=-1)

    ppad = max(128, ((proj_size + 127) // 128) * 128)
    wp = jnp.zeros((hidden, ppad), jnp.float32).at[:, :proj_size].set(params['proj_w'])
    bp = jnp.zeros((1, ppad), jnp.float32).at[:, :proj_size].set(params['proj_b'])

    return {
        'emb_ln_g': params['emb_ln_g'], 'emb_ln_b': params['emb_ln_b'],
        'wqkv': wqkv.astype(jnp.bfloat16), 'bqkv': bqkv,
        'wo': stack_w('wo'), 'bo': stack('bo'),
        'ln1_g': stack('ln1_g'), 'ln1_b': stack('ln1_b'),
        'wi': stack_w('wi'), 'bi': stack('bi'),
        'wd': stack_w('wd'), 'bd': stack('bd'),
        'ln2_g': stack('ln2_g'), 'ln2_b': stack('ln2_b'),
        'wp': wp.astype(jnp.bfloat16), 'bp': bp,
        'proj_size': proj_size,
    }


def bert_dssm_forward(params, packed, input_ids, is_query=True, *, num_heads, head_dim):
    """input_ids: int32 [B, S].  Returns L2-normalized [B, proj_size] embeddings."""
    token_type_ids = jnp.zeros_like(input_ids) if is_query else jnp.ones_like(input_ids)
    attention_mask = input_ids != PAD_TOKEN_ID
    mask_i = attention_mask.astype(jnp.int32)
    # XLM-R position ids: cumsum over non-pad tokens, offset by padding_idx.
    position_ids = jnp.cumsum(mask_i, axis=1) * mask_i + PAD_TOKEN_ID

    # Glue: embedding-table gathers (no clean Pallas equivalent for small gathers).
    emb = (params['word_emb'][input_ids]
           + params['pos_emb'][position_ids]
           + params['type_emb'][token_type_ids]).astype(jnp.float32)

    mask_bias = (1.0 - attention_mask.astype(jnp.float32)) * MASK_BIAS   # kept f32

    out_pad = fused_encoder(packed, emb, mask_bias,
                            num_heads=num_heads, head_dim=head_dim)
    return out_pad[:, :packed['proj_size']]


# ----------------------------------- main -------------------------------------

if __name__ == "__main__":
    # Small synthetic config consistent with the module's forward.
    B, S = 2, 8
    HIDDEN, NUM_HEADS, NUM_LAYERS = 32, 2, 2
    HEAD_DIM = HIDDEN // NUM_HEADS
    INTERMEDIATE = 64
    VOCAB, MAX_POS, TYPE_VOCAB = 100, 32, 2
    PROJ_SIZE = 16

    key = jax.random.PRNGKey(0)
    k_ids, k_params = jax.random.split(key)

    params = init_params(k_params, vocab_size=VOCAB, max_pos=MAX_POS,
                         type_vocab=TYPE_VOCAB, hidden=HIDDEN,
                         num_layers=NUM_LAYERS, intermediate=INTERMEDIATE,
                         proj_size=PROJ_SIZE)
    packed = pack_params(params, head_dim=HEAD_DIM)

    ids = jax.random.randint(k_ids, (B, S), minval=2, maxval=VOCAB, dtype=jnp.int32)
    ids = ids.at[1, 5:].set(PAD_TOKEN_ID)   # pad tail of second sequence to exercise masking

    out = bert_dssm_forward(params, packed, ids, is_query=True,
                            num_heads=NUM_HEADS, head_dim=HEAD_DIM)
    out = jax.block_until_ready(out)

    assert out.shape == (B, PROJ_SIZE)
    assert bool(jnp.all(jnp.isfinite(out)))
    # rows should be unit-norm after F.normalize
    assert bool(jnp.all(jnp.abs(jnp.sum(out * out, axis=-1) - 1.0) < 1e-3))
    print("KERNEL_OK")
</pallas_src>

<mosaic_0001>
module attributes {stable_mosaic.version = 11 : i64} {
  func.func @fused_encoder_kernel(%arg0: i32, %arg1: i32, %arg2: memref<2x8x32xf32, #tpu.memory_space<vmem>>, %arg3: memref<2x8xf32, #tpu.memory_space<vmem>>, %arg4: memref<1x32xf32, #tpu.memory_space<vmem>>, %arg5: memref<1x32xf32, #tpu.memory_space<vmem>>, %arg6: memref<1x32x96xbf16, #tpu.memory_space<vmem>>, %arg7: memref<1x1x96xf32, #tpu.memory_space<vmem>>, %arg8: memref<1x32x32xbf16, #tpu.memory_space<vmem>>, %arg9: memref<1x1x32xf32, #tpu.memory_space<vmem>>, %arg10: memref<1x1x32xf32, #tpu.memory_space<vmem>>, %arg11: memref<1x1x32xf32, #tpu.memory_space<vmem>>, %arg12: memref<1x32x64xbf16, #tpu.memory_space<vmem>>, %arg13: memref<1x1x64xf32, #tpu.memory_space<vmem>>, %arg14: memref<1x64x32xbf16, #tpu.memory_space<vmem>>, %arg15: memref<1x1x32xf32, #tpu.memory_space<vmem>>, %arg16: memref<1x1x32xf32, #tpu.memory_space<vmem>>, %arg17: memref<1x1x32xf32, #tpu.memory_space<vmem>>, %arg18: memref<32x128xbf16, #tpu.memory_space<vmem>>, %arg19: memref<1x128xf32, #tpu.memory_space<vmem>>, %arg20: memref<2x128xf32, #tpu.memory_space<vmem>>, %arg21: memref<16x32xf32, #tpu.memory_space<vmem>>) attributes {dimension_semantics = [#tpu.dimension_semantics<parallel>, #tpu.dimension_semantics<arbitrary>], iteration_bounds = array<i64: 1, 2>, scalar_prefetch = 0 : i64, scratch_operands = 1 : i64, tpu.core_type = #tpu.core_type<tc>, window_params = [{transform_indices = @transform_0, window_bounds = array<i64: 2, 8, 32>}, {transform_indices = @transform_1, window_bounds = array<i64: 2, 8>}, {pipeline_mode = #tpu.pipeline_mode<synchronous>, transform_indices = @transform_2, window_bounds = array<i64: 1, 32>}, {pipeline_mode = #tpu.pipeline_mode<synchronous>, transform_indices = @transform_3, window_bounds = array<i64: 1, 32>}, {transform_indices = @transform_4, window_bounds = array<i64: 1, 32, 96>}, {transform_indices = @transform_5, window_bounds = array<i64: 1, 1, 96>}, {transform_indices = @transform_6, window_bounds = array<i64: 1, 32, 32>}, {transform_indices = @transform_7, window_bounds = array<i64: 1, 1, 32>}, {transform_indices = @transform_8, window_bounds = array<i64: 1, 1, 32>}, {transform_indices = @transform_9, window_bounds = array<i64: 1, 1, 32>}, {transform_indices = @transform_10, window_bounds = array<i64: 1, 32, 64>}, {transform_indices = @transform_11, window_bounds = array<i64: 1, 1, 64>}, {transform_indices = @transform_12, window_bounds = array<i64: 1, 64, 32>}, {transform_indices = @transform_13, window_bounds = array<i64: 1, 1, 32>}, {transform_indices = @transform_14, window_bounds = array<i64: 1, 1, 32>}, {transform_indices = @transform_15, window_bounds = array<i64: 1, 1, 32>}, {pipeline_mode = #tpu.pipeline_mode<synchronous>, transform_indices = @transform_16, window_bounds = array<i64: 32, 128>}, {pipeline_mode = #tpu.pipeline_mode<synchronous>, transform_indices = @transform_17, window_bounds = array<i64: 1, 128>}, {transform_indices = @transform_18, window_bounds = array<i64: 2, 128>}]} {
    %c0_i32 = arith.constant 0 : i32
    %0 = arith.cmpi eq, %arg1, %c0_i32 : i32
    %1 = arith.extui %0 : i1 to i32
    %c0_i32_0 = arith.constant 0 : i32
    %2 = arith.cmpi ne, %1, %c0_i32_0 : i32
    scf.if %2 {
      %c0_68 = arith.constant 0 : index
      %c0_69 = arith.constant 0 : index
      %c0_70 = arith.constant 0 : index
      %159 = vector.load %arg2[%c0_68, %c0_69, %c0_70] : memref<2x8x32xf32, #tpu.memory_space<vmem>>, vector<2x8x32xf32>
      %160 = vector.shape_cast %159 : vector<2x8x32xf32> to vector<16x32xf32>
      %c0_71 = arith.constant 0 : index
      %c0_72 = arith.constant 0 : index
      %161 = vector.load %arg4[%c0_71, %c0_72] : memref<1x32xf32, #tpu.memory_space<vmem>>, vector<1x32xf32>
      %c0_73 = arith.constant 0 : index
      %c0_74 = arith.constant 0 : index
      %162 = vector.load %arg5[%c0_73, %c0_74] : memref<1x32xf32, #tpu.memory_space<vmem>>, vector<1x32xf32>
      %cst_75 = arith.constant dense<0.000000e+00> : vector<16xf32>
      %163 = vector.multi_reduction <add>, %160, %cst_75 [1] : vector<16x32xf32> to vector<16xf32>
      %164 = vector.shape_cast %163 : vector<16xf32> to vector<16x1xf32>
      %cst_76 = arith.constant 3.200000e+01 : f32
      %165 = vector.broadcast %cst_76 : f32 to vector<16x1xf32>
      %166 = arith.divf %164, %165 : vector<16x1xf32>
      %167 = vector.broadcast %166 : vector<16x1xf32> to vector<16x32xf32>
      %168 = arith.subf %160, %167 : vector<16x32xf32>
      %169 = arith.mulf %168, %168 : vector<16x32xf32>
      %cst_77 = arith.constant dense<0.000000e+00> : vector<16xf32>
      %170 = vector.multi_reduction <add>, %169, %cst_77 [1] : vector<16x32xf32> to vector<16xf32>
      %171 = vector.shape_cast %170 : vector<16xf32> to vector<16x1xf32>
      %cst_78 = arith.constant 3.200000e+01 : f32
      %172 = vector.broadcast %cst_78 : f32 to vector<16x1xf32>
      %173 = arith.divf %171, %172 : vector<16x1xf32>
      %174 = vector.broadcast %166 : vector<16x1xf32> to vector<16x32xf32>
      %175 = arith.subf %160, %174 : vector<16x32xf32>
      %cst_79 = arith.constant 9.99999974E-6 : f32
      %176 = vector.broadcast %cst_79 : f32 to vector<16x1xf32>
      %177 = arith.addf %173, %176 : vector<16x1xf32>
      %178 = math.rsqrt %177 : vector<16x1xf32>
      %179 = vector.broadcast %178 : vector<16x1xf32> to vector<16x32xf32>
      %180 = arith.mulf %175, %179 : vector<16x32xf32>
      %181 = vector.broadcast %161 : vector<1x32xf32> to vector<16x32xf32>
      %182 = arith.mulf %180, %181 : vector<16x32xf32>
      %183 = vector.broadcast %162 : vector<1x32xf32> to vector<16x32xf32>
      %184 = arith.addf %182, %183 : vector<16x32xf32>
      %c0_80 = arith.constant 0 : index
      %c0_81 = arith.constant 0 : index
      %185 = vector.load %arg21[%c0_80, %c0_81] : memref<16x32xf32, #tpu.memory_space<vmem>>, vector<16x32xf32>
      tpu.vector_store %arg21[%c0_80, %c0_81], %184 {strides = array<i32>} : memref<16x32xf32, #tpu.memory_space<vmem>>, vector<16x32xf32>,
    } else {
    }
    %c0 = arith.constant 0 : index
    %c0_1 = arith.constant 0 : index
    %3 = vector.load %arg21[%c0, %c0_1] : memref<16x32xf32, #tpu.memory_space<vmem>>, vector<16x32xf32>
    %4 = arith.truncf %3 : vector<16x32xf32> to vector<16x32xbf16>
    %c0_2 = arith.constant 0 : index
    %c0_3 = arith.constant 0 : index
    %c0_4 = arith.constant 0 : index
    %5 = vector.load %arg6[%c0_2, %c0_3, %c0_4] : memref<1x32x96xbf16, #tpu.memory_space<vmem>>, vector<1x32x96xbf16>
    %6 = vector.shape_cast %5 : vector<1x32x96xbf16> to vector<32x96xbf16>
    %cst = arith.constant dense<0.000000e+00> : vector<16x96xf32>
    %7 = tpu.matmul %4, %6, %cst {dimension_numbers = #tpu.dot_dimension_numbers<[1], [0], [0], [1], [0, 0, 1, 1], [], []>} : vector<16x32xbf16>, vector<32x96xbf16>, vector<16x96xf32> -> vector<16x96xf32>
    %c0_5 = arith.constant 0 : index
    %c0_6 = arith.constant 0 : index
    %c0_7 = arith.constant 0 : index
    %8 = vector.load %arg7[%c0_5, %c0_6, %c0_7] : memref<1x1x96xf32, #tpu.memory_space<vmem>>, vector<1x1x96xf32>
    %9 = vector.shape_cast %8 : vector<1x1x96xf32> to vector<1x96xf32>
    %10 = vector.broadcast %9 : vector<1x96xf32> to vector<16x96xf32>
    %11 = arith.addf %7, %10 : vector<16x96xf32>
    %c0_8 = arith.constant 0 : index
    %c0_9 = arith.constant 0 : index
    %12 = vector.load %arg3[%c0_8, %c0_9] : memref<2x8xf32, #tpu.memory_space<vmem>>, vector<2x8xf32>
    %13 = vector.shape_cast %12 : vector<2x8xf32> to vector<2x1x8xf32>
    %14 = vector.extract_strided_slice %11 {offsets = [0, 0], sizes = [16, 16], strides = [1, 1]} : vector<16x96xf32> to vector<16x16xf32>
    %15 = vector.shape_cast %14 : vector<16x16xf32> to vector<2x8x16xf32>
    %16 = arith.truncf %15 : vector<2x8x16xf32> to vector<2x8x16xbf16>
    %17 = vector.extract_strided_slice %11 {offsets = [0, 32], sizes = [16, 16], strides = [1, 1]} : vector<16x96xf32> to vector<16x16xf32>
    %18 = vector.shape_cast %17 : vector<16x16xf32> to vector<2x8x16xf32>
    %19 = arith.truncf %18 : vector<2x8x16xf32> to vector<2x8x16xbf16>
    %20 = vector.extract_strided_slice %11 {offsets = [0, 64], sizes = [16, 16], strides = [1, 1]} : vector<16x96xf32> to vector<16x16xf32>
    %21 = vector.shape_cast %20 : vector<16x16xf32> to vector<2x8x16xf32>
    %22 = arith.truncf %21 : vector<2x8x16xf32> to vector<2x8x16xbf16>
    "tpu.trace_start"() <{level = 10 : i32, message = "bqd,bkd->bqk"}> : () -> ()
    %cst_10 = arith.constant dense<0.000000e+00> : vector<2x8x8xf32>
    %23 = tpu.matmul %16, %19, %cst_10 {dimension_numbers = #tpu.dot_dimension_numbers<[2], [2], [1], [1], [0, 0, 0, 1, 1, 1], [0], [0]>} : vector<2x8x16xbf16>, vector<2x8x16xbf16>, vector<2x8x8xf32> -> vector<2x8x8xf32>
    "tpu.trace_stop"() : () -> ()
    %24 = vector.broadcast %13 : vector<2x1x8xf32> to vector<2x8x8xf32>
    %25 = arith.addf %23, %24 : vector<2x8x8xf32>
    %cst_11 = arith.constant dense<0xFF800000> : vector<2x8xf32>
    %26 = vector.multi_reduction <maximumf>, %25, %cst_11 [2] : vector<2x8x8xf32> to vector<2x8xf32>
    %27 = vector.shape_cast %26 : vector<2x8xf32> to vector<2x8x1xf32>
    %28 = vector.broadcast %27 : vector<2x8x1xf32> to vector<2x8x8xf32>
    %29 = arith.subf %25, %28 : vector<2x8x8xf32>
    %30 = math.exp %29 : vector<2x8x8xf32>
    %cst_12 = arith.constant dense<0.000000e+00> : vector<2x8xf32>
    %31 = vector.multi_reduction <add>, %30, %cst_12 [2] : vector<2x8x8xf32> to vector<2x8xf32>
    %32 = vector.shape_cast %31 : vector<2x8xf32> to vector<2x8x1xf32>
    %33 = tpu.reciprocal %32 {approx = true} : vector<2x8x1xf32> -> vector<2x8x1xf32>
    %34 = vector.broadcast %33 : vector<2x8x1xf32> to vector<2x8x8xf32>
    %35 = arith.mulf %30, %34 : vector<2x8x8xf32>
    %36 = arith.truncf %35 : vector<2x8x8xf32> to vector<2x8x8xbf16>
    "tpu.trace_start"() <{level = 10 : i32, message = "bqk,bkd->bqd"}> : () -> ()
    %cst_13 = arith.constant dense<0.000000e+00> : vector<2x8x16xf32>
    %37 = tpu.matmul %36, %22, %cst_13 {dimension_numbers = #tpu.dot_dimension_numbers<[2], [1], [1], [2], [0, 0, 0, 1, 1, 2], [0], [0]>} : vector<2x8x8xbf16>, vector<2x8x16xbf16>, vector<2x8x16xf32> -> vector<2x8x16xf32>
    "tpu.trace_stop"() : () -> ()
    %38 = vector.extract_strided_slice %11 {offsets = [0, 16], sizes = [16, 16], strides = [1, 1]} : vector<16x96xf32> to vector<16x16xf32>
    %39 = vector.shape_cast %38 : vector<16x16xf32> to vector<2x8x16xf32>
    %40 = arith.truncf %39 : vector<2x8x16xf32> to vector<2x8x16xbf16>
    %41 = vector.extract_strided_slice %11 {offsets = [0, 48], sizes = [16, 16], strides = [1, 1]} : vector<16x96xf32> to vector<16x16xf32>
    %42 = vector.shape_cast %41 : vector<16x16xf32> to vector<2x8x16xf32>
    %43 = arith.truncf %42 : vector<2x8x16xf32> to vector<2x8x16xbf16>
    %44 = vector.extract_strided_slice %11 {offsets = [0, 80], sizes = [16, 16], strides = [1, 1]} : vector<16x96xf32> to vector<16x16xf32>
    %45 = vector.shape_cast %44 : vector<16x16xf32> to vector<2x8x16xf32>
    %46 = arith.truncf %45 : vector<2x8x16xf32> to vector<2x8x16xbf16>
    "tpu.trace_start"() <{level = 10 : i32, message = "bqd,bkd->bqk"}> : () -> ()
    %cst_14 = arith.constant dense<0.000000e+00> : vector<2x8x8xf32>
    %47 = tpu.matmul %40, %43, %cst_14 {dimension_numbers = #tpu.dot_dimension_numbers<[2], [2], [1], [1], [0, 0, 0, 1, 1, 1], [0], [0]>} : vector<2x8x16xbf16>, vector<2x8x16xbf16>, vector<2x8x8xf32> -> vector<2x8x8xf32>
    "tpu.trace_stop"() : () -> ()
    %48 = vector.broadcast %13 : vector<2x1x8xf32> to vector<2x8x8xf32>
    %49 = arith.addf %47, %48 : vector<2x8x8xf32>
    %cst_15 = arith.constant dense<0xFF800000> : vector<2x8xf32>
    %50 = vector.multi_reduction <maximumf>, %49, %cst_15 [2] : vector<2x8x8xf32> to vector<2x8xf32>
    %51 = vector.shape_cast %50 : vector<2x8xf32> to vector<2x8x1xf32>
    %52 = vector.broadcast %51 : vector<2x8x1xf32> to vector<2x8x8xf32>
    %53 = arith.subf %49, %52 : vector<2x8x8xf32>
    %54 = math.exp %53 : vector<2x8x8xf32>
    %cst_16 = arith.constant dense<0.000000e+00> : vector<2x8xf32>
    %55 = vector.multi_reduction <add>, %54, %cst_16 [2] : vector<2x8x8xf32> to vector<2x8xf32>
    %56 = vector.shape_cast %55 : vector<2x8xf32> to vector<2x8x1xf32>
    %57 = tpu.reciprocal %56 {approx = true} : vector<2x8x1xf32> -> vector<2x8x1xf32>
    %58 = vector.broadcast %57 : vector<2x8x1xf32> to vector<2x8x8xf32>
    %59 = arith.mulf %54, %58 : vector<2x8x8xf32>
    %60 = arith.truncf %59 : vector<2x8x8xf32> to vector<2x8x8xbf16>
    "tpu.trace_start"() <{level = 10 : i32, message = "bqk,bkd->bqd"}> : () -> ()
    %cst_17 = arith.constant dense<0.000000e+00> : vector<2x8x16xf32>
    %61 = tpu.matmul %60, %46, %cst_17 {dimension_numbers = #tpu.dot_dimension_numbers<[2], [1], [1], [2], [0, 0, 0, 1, 1, 2], [0], [0]>} : vector<2x8x8xbf16>, vector<2x8x16xbf16>, vector<2x8x16xf32> -> vector<2x8x16xf32>
    "tpu.trace_stop"() : () -> ()
    %62 = tpu.concatenate %37, %61 in 2 : vector<2x8x16xf32>, vector<2x8x16xf32> -> vector<2x8x32xf32>
    %63 = vector.shape_cast %62 : vector<2x8x32xf32> to vector<16x32xf32>
    %64 = arith.truncf %63 : vector<16x32xf32> to vector<16x32xbf16>
    %c0_18 = arith.constant 0 : index
    %c0_19 = arith.constant 0 : index
    %c0_20 = arith.constant 0 : index
    %65 = vector.load %arg8[%c0_18, %c0_19, %c0_20] : memref<1x32x32xbf16, #tpu.memory_space<vmem>>, vector<1x32x32xbf16>
    %66 = vector.shape_cast %65 : vector<1x32x32xbf16> to vector<32x32xbf16>
    %cst_21 = arith.constant dense<0.000000e+00> : vector<16x32xf32>
    %67 = tpu.matmul %64, %66, %cst_21 {dimension_numbers = #tpu.dot_dimension_numbers<[1], [0], [0], [1], [0, 0, 1, 1], [], []>} : vector<16x32xbf16>, vector<32x32xbf16>, vector<16x32xf32> -> vector<16x32xf32>
    %c0_22 = arith.constant 0 : index
    %c0_23 = arith.constant 0 : index
    %c0_24 = arith.constant 0 : index
    %68 = vector.load %arg9[%c0_22, %c0_23, %c0_24] : memref<1x1x32xf32, #tpu.memory_space<vmem>>, vector<1x1x32xf32>
    %69 = vector.shape_cast %68 : vector<1x1x32xf32> to vector<1x32xf32>
    %70 = vector.broadcast %69 : vector<1x32xf32> to vector<16x32xf32>
    %71 = arith.addf %67, %70 : vector<16x32xf32>
    %72 = arith.addf %71, %3 : vector<16x32xf32>
    %c0_25 = arith.constant 0 : index
    %c0_26 = arith.constant 0 : index
    %c0_27 = arith.constant 0 : index
    %73 = vector.load %arg10[%c0_25, %c0_26, %c0_27] : memref<1x1x32xf32, #tpu.memory_space<vmem>>, vector<1x1x32xf32>
    %74 = vector.shape_cast %73 : vector<1x1x32xf32> to vector<1x32xf32>
    %c0_28 = arith.constant 0 : index
    %c0_29 = arith.constant 0 : index
    %c0_30 = arith.constant 0 : index
    %75 = vector.load %arg11[%c0_28, %c0_29, %c0_30] : memref<1x1x32xf32, #tpu.memory_space<vmem>>, vector<1x1x32xf32>
    %76 = vector.shape_cast %75 : vector<1x1x32xf32> to vector<1x32xf32>
    %cst_31 = arith.constant dense<0.000000e+00> : vector<16xf32>
    %77 = vector.multi_reduction <add>, %72, %cst_31 [1] : vector<16x32xf32> to vector<16xf32>
    %78 = vector.shape_cast %77 : vector<16xf32> to vector<16x1xf32>
    %cst_32 = arith.constant 3.200000e+01 : f32
    %79 = vector.broadcast %cst_32 : f32 to vector<16x1xf32>
    %80 = arith.divf %78, %79 : vector<16x1xf32>
    %81 = vector.broadcast %80 : vector<16x1xf32> to vector<16x32xf32>
    %82 = arith.subf %72, %81 : vector<16x32xf32>
    %83 = arith.mulf %82, %82 : vector<16x32xf32>
    %cst_33 = arith.constant dense<0.000000e+00> : vector<16xf32>
    %84 = vector.multi_reduction <add>, %83, %cst_33 [1] : vector<16x32xf32> to vector<16xf32>
    %85 = vector.shape_cast %84 : vector<16xf32> to vector<16x1xf32>
    %cst_34 = arith.constant 3.200000e+01 : f32
    %86 = vector.broadcast %cst_34 : f32 to vector<16x1xf32>
    %87 = arith.divf %85, %86 : vector<16x1xf32>
    %88 = vector.broadcast %80 : vector<16x1xf32> to vector<16x32xf32>
    %89 = arith.subf %72, %88 : vector<16x32xf32>
    %cst_35 = arith.constant 9.99999974E-6 : f32
    %90 = vector.broadcast %cst_35 : f32 to vector<16x1xf32>
    %91 = arith.addf %87, %90 : vector<16x1xf32>
    %92 = math.rsqrt %91 : vector<16x1xf32>
    %93 = vector.broadcast %92 : vector<16x1xf32> to vector<16x32xf32>
    %94 = arith.mulf %89, %93 : vector<16x32xf32>
    %95 = vector.broadcast %74 : vector<1x32xf32> to vector<16x32xf32>
    %96 = arith.mulf %94, %95 : vector<16x32xf32>
    %97 = vector.broadcast %76 : vector<1x32xf32> to vector<16x32xf32>
    %98 = arith.addf %96, %97 : vector<16x32xf32>
    %99 = arith.truncf %98 : vector<16x32xf32> to vector<16x32xbf16>
    %c0_36 = arith.constant 0 : index
    %c0_37 = arith.constant 0 : index
    %c0_38 = arith.constant 0 : index
    %100 = vector.load %arg12[%c0_36, %c0_37, %c0_38] : memref<1x32x64xbf16, #tpu.memory_space<vmem>>, vector<1x32x64xbf16>
    %101 = vector.shape_cast %100 : vector<1x32x64xbf16> to vector<32x64xbf16>
    %cst_39 = arith.constant dense<0.000000e+00> : vector<16x64xf32>
    %102 = tpu.matmul %99, %101, %cst_39 {dimension_numbers = #tpu.dot_dimension_numbers<[1], [0], [0], [1], [0, 0, 1, 1], [], []>} : vector<16x32xbf16>, vector<32x64xbf16>, vector<16x64xf32> -> vector<16x64xf32>
    %c0_40 = arith.constant 0 : index
    %c0_41 = arith.constant 0 : index
    %c0_42 = arith.constant 0 : index
    %103 = vector.load %arg13[%c0_40, %c0_41, %c0_42] : memref<1x1x64xf32, #tpu.memory_space<vmem>>, vector<1x1x64xf32>
    %104 = vector.shape_cast %103 : vector<1x1x64xf32> to vector<1x64xf32>
    %105 = vector.broadcast %104 : vector<1x64xf32> to vector<16x64xf32>
    %106 = arith.addf %102, %105 : vector<16x64xf32>
    %107 = arith.mulf %106, %106 : vector<16x64xf32>
    %108 = arith.mulf %106, %107 : vector<16x64xf32>
    %cst_43 = arith.constant 4.471500e-02 : f32
    %109 = vector.broadcast %cst_43 : f32 to vector<16x64xf32>
    %110 = arith.mulf %109, %108 : vector<16x64xf32>
    %111 = arith.addf %106, %110 : vector<16x64xf32>
    %cst_44 = arith.constant 0.797884583 : f32
    %112 = vector.broadcast %cst_44 : f32 to vector<16x64xf32>
    %113 = arith.mulf %112, %111 : vector<16x64xf32>
    %114 = math.tanh %113 : vector<16x64xf32>
    %cst_45 = arith.constant 1.000000e+00 : f32
    %115 = vector.broadcast %cst_45 : f32 to vector<16x64xf32>
    %116 = arith.addf %115, %114 : vector<16x64xf32>
    %cst_46 = arith.constant 5.000000e-01 : f32
    %117 = vector.broadcast %cst_46 : f32 to vector<16x64xf32>
    %118 = arith.mulf %117, %116 : vector<16x64xf32>
    %119 = arith.mulf %106, %118 : vector<16x64xf32>
    %120 = arith.truncf %119 : vector<16x64xf32> to vector<16x64xbf16>
    %c0_47 = arith.constant 0 : index
    %c0_48 = arith.constant 0 : index
    %c0_49 = arith.constant 0 : index
    %121 = vector.load %arg14[%c0_47, %c0_48, %c0_49] : memref<1x64x32xbf16, #tpu.memory_space<vmem>>, vector<1x64x32xbf16>
    %122 = vector.shape_cast %121 : vector<1x64x32xbf16> to vector<64x32xbf16>
    %cst_50 = arith.constant dense<0.000000e+00> : vector<16x32xf32>
    %123 = tpu.matmul %120, %122, %cst_50 {dimension_numbers = #tpu.dot_dimension_numbers<[1], [0], [0], [1], [0, 0, 1, 1], [], []>} : vector<16x64xbf16>, vector<64x32xbf16>, vector<16x32xf32> -> vector<16x32xf32>
    %c0_51 = arith.constant 0 : index
    %c0_52 = arith.constant 0 : index
    %c0_53 = arith.constant 0 : index
    %124 = vector.load %arg15[%c0_51, %c0_52, %c0_53] : memref<1x1x32xf32, #tpu.memory_space<vmem>>, vector<1x1x32xf32>
    %125 = vector.shape_cast %124 : vector<1x1x32xf32> to vector<1x32xf32>
    %126 = vector.broadcast %125 : vector<1x32xf32> to vector<16x32xf32>
    %127 = arith.addf %123, %126 : vector<16x32xf32>
    %128 = arith.addf %127, %98 : vector<16x32xf32>
    %c0_54 = arith.constant 0 : index
    %c0_55 = arith.constant 0 : index
    %c0_56 = arith.constant 0 : index
    %129 = vector.load %arg16[%c0_54, %c0_55, %c0_56] : memref<1x1x32xf32, #tpu.memory_space<vmem>>, vector<1x1x32xf32>
    %130 = vector.shape_cast %129 : vector<1x1x32xf32> to vector<1x32xf32>
    %c0_57 = arith.constant 0 : index
    %c0_58 = arith.constant 0 : index
    %c0_59 = arith.constant 0 : index
    %131 = vector.load %arg17[%c0_57, %c0_58, %c0_59] : memref<1x1x32xf32, #tpu.memory_space<vmem>>, vector<1x1x32xf32>
    %132 = vector.shape_cast %131 : vector<1x1x32xf32> to vector<1x32xf32>
    %cst_60 = arith.constant dense<0.000000e+00> : vector<16xf32>
    %133 = vector.multi_reduction <add>, %128, %cst_60 [1] : vector<16x32xf32> to vector<16xf32>
    %134 = vector.shape_cast %133 : vector<16xf32> to vector<16x1xf32>
    %cst_61 = arith.constant 3.200000e+01 : f32
    %135 = vector.broadcast %cst_61 : f32 to vector<16x1xf32>
    %136 = arith.divf %134, %135 : vector<16x1xf32>
    %137 = vector.broadcast %136 : vector<16x1xf32> to vector<16x32xf32>
    %138 = arith.subf %128, %137 : vector<16x32xf32>
    %139 = arith.mulf %138, %138 : vector<16x32xf32>
    %cst_62 = arith.constant dense<0.000000e+00> : vector<16xf32>
    %140 = vector.multi_reduction <add>, %139, %cst_62 [1] : vector<16x32xf32> to vector<16xf32>
    %141 = vector.shape_cast %140 : vector<16xf32> to vector<16x1xf32>
    %cst_63 = arith.constant 3.200000e+01 : f32
    %142 = vector.broadcast %cst_63 : f32 to vector<16x1xf32>
    %143 = arith.divf %141, %142 : vector<16x1xf32>
    %144 = vector.broadcast %136 : vector<16x1xf32> to vector<16x32xf32>
    %145 = arith.subf %128, %144 : vector<16x32xf32>
    %cst_64 = arith.constant 9.99999974E-6 : f32
    %146 = vector.broadcast %cst_64 : f32 to vector<16x1xf32>
    %147 = arith.addf %143, %146 : vector<16x1xf32>
    %148 = math.rsqrt %147 : vector<16x1xf32>
    %149 = vector.broadcast %148 : vector<16x1xf32> to vector<16x32xf32>
    %150 = arith.mulf %145, %149 : vector<16x32xf32>
    %151 = vector.broadcast %130 : vector<1x32xf32> to vector<16x32xf32>
    %152 = arith.mulf %150, %151 : vector<16x32xf32>
    %153 = vector.broadcast %132 : vector<1x32xf32> to vector<16x32xf32>
    %154 = arith.addf %152, %153 : vector<16x32xf32>
    %c0_65 = arith.constant 0 : index
    %c0_66 = arith.constant 0 : index
    %155 = vector.load %arg21[%c0_65, %c0_66] : memref<16x32xf32, #tpu.memory_space<vmem>>, vector<16x32xf32>
    tpu.vector_store %arg21[%c0_65, %c0_66], %154 {strides = array<i32>} : memref<16x32xf32, #tpu.memory_space<vmem>>, vector<16x32xf32>,
    %c1_i32 = arith.constant 1 : i32
    %156 = arith.cmpi eq, %arg1, %c1_i32 : i32
    %157 = arith.extui %156 : i1 to i32
    %c0_i32_67 = arith.constant 0 : i32
    %158 = arith.cmpi ne, %157, %c0_i32_67 : i32
    scf.if %158 {
      %159 = vector.shape_cast %154 : vector<16x32xf32> to vector<2x8x32xf32>
      %160 = vector.extract_strided_slice %159 {offsets = [0, 0, 0], sizes = [2, 1, 32], strides = [1, 1, 1]} : vector<2x8x32xf32> to vector<2x1x32xf32>
      %161 = vector.shape_cast %160 : vector<2x1x32xf32> to vector<2x32xf32>
      %162 = arith.truncf %161 : vector<2x32xf32> to vector<2x32xbf16>
      %c0_68 = arith.constant 0 : index
      %c0_69 = arith.constant 0 : index
      %163 = vector.load %arg18[%c0_68, %c0_69] : memref<32x128xbf16, #tpu.memory_space<vmem>>, vector<32x128xbf16>
      %cst_70 = arith.constant dense<0.000000e+00> : vector<2x128xf32>
      %164 = tpu.matmul %162, %163, %cst_70 {dimension_numbers = #tpu.dot_dimension_numbers<[1], [0], [0], [1], [0, 0, 1, 1], [], []>} : vector<2x32xbf16>, vector<32x128xbf16>, vector<2x128xf32> -> vector<2x128xf32>
      %c0_71 = arith.constant 0 : index
      %c0_72 = arith.constant 0 : index
      %165 = vector.load %arg19[%c0_71, %c0_72] : memref<1x128xf32, #tpu.memory_space<vmem>>, vector<1x128xf32>
      %166 = vector.broadcast %165 : vector<1x128xf32> to vector<2x128xf32>
      %167 = arith.addf %164, %166 : vector<2x128xf32>
      %168 = arith.mulf %167, %167 : vector<2x128xf32>
      %cst_73 = arith.constant dense<0.000000e+00> : vector<2xf32>
      %169 = vector.multi_reduction <add>, %168, %cst_73 [1] : vector<2x128xf32> to vector<2xf32>
      %170 = vector.shape_cast %169 : vector<2xf32> to vector<2x1xf32>
      %cst_74 = arith.constant 1.000000e-24 : f32
      %171 = vector.broadcast %cst_74 : f32 to vector<2x1xf32>
      %172 = arith.maximumf %170, %171 : vector<2x1xf32>
      %173 = math.rsqrt %172 : vector<2x1xf32>
      %174 = vector.broadcast %173 : vector<2x1xf32> to vector<2x128xf32>
      %175 = arith.mulf %167, %174 : vector<2x128xf32>
      %c0_75 = arith.constant 0 : index
      %c0_76 = arith.constant 0 : index
      %176 = vector.load %arg20[%c0_75, %c0_76] : memref<2x128xf32, #tpu.memory_space<vmem>>, vector<2x128xf32>
      tpu.vector_store %arg20[%c0_75, %c0_76], %175 {strides = array<i32>} : memref<2x128xf32, #tpu.memory_space<vmem>>, vector<2x128xf32>,
    } else {
    }
    return
  }
  func.func @transform_0(%arg0: i32, %arg1: i32) -> (i32, i32, i32) {
    %c0_i32 = arith.constant 0 : i32
    %c0_i32_0 = arith.constant 0 : i32
    %c0_i32_1 = arith.constant 0 : i32
    return %arg0, %c0_i32, %c0_i32_0 : i32, i32, i32
  }
  func.func @transform_1(%arg0: i32, %arg1: i32) -> (i32, i32) {
    %c0_i32 = arith.constant 0 : i32
    %c0_i32_0 = arith.constant 0 : i32
    return %arg0, %c0_i32 : i32, i32
  }
  func.func @transform_2(%arg0: i32, %arg1: i32) -> (i32, i32) {
    %c0_i32 = arith.constant 0 : i32
    %c0_i32_0 = arith.constant 0 : i32
    %c0_i32_1 = arith.constant 0 : i32
    return %c0_i32, %c0_i32_0 : i32, i32
  }
  func.func @transform_3(%arg0: i32, %arg1: i32) -> (i32, i32) {
    %c0_i32 = arith.constant 0 : i32
    %c0_i32_0 = arith.constant 0 : i32
    %c0_i32_1 = arith.constant 0 : i32
    return %c0_i32, %c0_i32_0 : i32, i32
  }
  func.func @transform_4(%arg0: i32, %arg1: i32) -> (i32, i32, i32) {
    %c0_i32 = arith.constant 0 : i32
    %c0_i32_0 = arith.constant 0 : i32
    %c0_i32_1 = arith.constant 0 : i32
    return %arg1, %c0_i32, %c0_i32_0 : i32, i32, i32
  }
  func.func @transform_5(%arg0: i32, %arg1: i32) -> (i32, i32, i32) {
    %c0_i32 = arith.constant 0 : i32
    %c0_i32_0 = arith.constant 0 : i32
    %c0_i32_1 = arith.constant 0 : i32
    return %arg1, %c0_i32, %c0_i32_0 : i32, i32, i32
  }
  func.func @transform_6(%arg0: i32, %arg1: i32) -> (i32, i32, i32) {
    %c0_i32 = arith.constant 0 : i32
    %c0_i32_0 = arith.constant 0 : i32
    %c0_i32_1 = arith.constant 0 : i32
    return %arg1, %c0_i32, %c0_i32_0 : i32, i32, i32
  }
  func.func @transform_7(%arg0: i32, %arg1: i32) -> (i32, i32, i32) {
    %c0_i32 = arith.constant 0 : i32
    %c0_i32_0 = arith.constant 0 : i32
    %c0_i32_1 = arith.constant 0 : i32
    return %arg1, %c0_i32, %c0_i32_0 : i32, i32, i32
  }
  func.func @transform_8(%arg0: i32, %arg1: i32) -> (i32, i32, i32) {
    %c0_i32 = arith.constant 0 : i32
    %c0_i32_0 = arith.constant 0 : i32
    %c0_i32_1 = arith.constant 0 : i32
    return %arg1, %c0_i32, %c0_i32_0 : i32, i32, i32
  }
  func.func @transform_9(%arg0: i32, %arg1: i32) -> (i32, i32, i32) {
    %c0_i32 = arith.constant 0 : i32
    %c0_i32_0 = arith.constant 0 : i32
    %c0_i32_1 = arith.constant 0 : i32
    return %arg1, %c0_i32, %c0_i32_0 : i32, i32, i32
  }
  func.func @transform_10(%arg0: i32, %arg1: i32) -> (i32, i32, i32) {
    %c0_i32 = arith.constant 0 : i32
    %c0_i32_0 = arith.constant 0 : i32
    %c0_i32_1 = arith.constant 0 : i32
    return %arg1, %c0_i32, %c0_i32_0 : i32, i32, i32
  }
  func.func @transform_11(%arg0: i32, %arg1: i32) -> (i32, i32, i32) {
    %c0_i32 = arith.constant 0 : i32
    %c0_i32_0 = arith.constant 0 : i32
    %c0_i32_1 = arith.constant 0 : i32
    return %arg1, %c0_i32, %c0_i32_0 : i32, i32, i32
  }
  func.func @transform_12(%arg0: i32, %arg1: i32) -> (i32, i32, i32) {
    %c0_i32 = arith.constant 0 : i32
    %c0_i32_0 = arith.constant 0 : i32
    %c0_i32_1 = arith.constant 0 : i32
    return %arg1, %c0_i32, %c0_i32_0 : i32, i32, i32
  }
  func.func @transform_13(%arg0: i32, %arg1: i32) -> (i32, i32, i32) {
    %c0_i32 = arith.constant 0 : i32
    %c0_i32_0 = arith.constant 0 : i32
    %c0_i32_1 = arith.constant 0 : i32
    return %arg1, %c0_i32, %c0_i32_0 : i32, i32, i32
  }
  func.func @transform_14(%arg0: i32, %arg1: i32) -> (i32, i32, i32) {
    %c0_i32 = arith.constant 0 : i32
    %c0_i32_0 = arith.constant 0 : i32
    %c0_i32_1 = arith.constant 0 : i32
    return %arg1, %c0_i32, %c0_i32_0 : i32, i32, i32
  }
  func.func @transform_15(%arg0: i32, %arg1: i32) -> (i32, i32, i32) {
    %c0_i32 = arith.constant 0 : i32
    %c0_i32_0 = arith.constant 0 : i32
    %c0_i32_1 = arith.constant 0 : i32
    return %arg1, %c0_i32, %c0_i32_0 : i32, i32, i32
  }
  func.func @transform_16(%arg0: i32, %arg1: i32) -> (i32, i32) {
    %c0_i32 = arith.constant 0 : i32
    %c0_i32_0 = arith.constant 0 : i32
    %c0_i32_1 = arith.constant 0 : i32
    return %c0_i32, %c0_i32_0 : i32, i32
  }
  func.func @transform_17(%arg0: i32, %arg1: i32) -> (i32, i32) {
    %c0_i32 = arith.constant 0 : i32
    %c0_i32_0 = arith.constant 0 : i32
    %c0_i32_1 = arith.constant 0 : i32
    return %c0_i32, %c0_i32_0 : i32, i32
  }
  func.func @transform_18(%arg0: i32, %arg1: i32) -> (i32, i32) {
    %c0_i32 = arith.constant 0 : i32
    %c0_i32_0 = arith.constant 0 : i32
    return %arg0, %c0_i32 : i32, i32
  }
}

</mosaic_0001>

<bundles_post_ra>
// kernel: tpu_custom_call.1
= control target key start
LH: loop header
LB: loop body
LE: loop exit
PB: predicated region body
PF: predicated region fallthrough
CT: control target
= control target key end

     0   :  { %s3668_s0 = inlined_call_operand.hbm [shape: f32[2,8,32], index: 0, kind: input, shape index: {}]   ;;  %s3669_s1 = inlined_call_operand.hbm [shape: f32[2,8], index: 1, kind: input, shape index: {}]   ;;  %s3670_s2 = inlined_call_operand.vmem [shape: f32[1,32], index: 2, kind: input, shape index: {}]   ;;  %s3671_s3 = inlined_call_operand.hbm [shape: f32[1,32], index: 3, kind: input, shape index: {}]   ;;  %s3672_s4 = inlined_call_operand.vmem [shape: bf16[2,32,96], index: 4, kind: input, shape index: {}]   ;;  %s3673_s5 = inlined_call_operand.hbm [shape: f32[2,1,96], index: 5, kind: input, shape index: {}]   ;;  %s3674_s6 = inlined_call_operand.vmem [shape: bf16[2,32,32], index: 6, kind: input, shape index: {}]   ;;  %s3675_s7 = inlined_call_operand.hbm [shape: f32[2,1,32], index: 7, kind: input, shape index: {}]   ;;  %s3676_s8 = inlined_call_operand.hbm [shape: f32[2,1,32], index: 8, kind: input, shape index: {}]   ;;  %s3677_s9 = inlined_call_operand.hbm [shape: f32[2,1,32], index: 9, kind: input, shape index: {}]   ;;  %s3678_s10 = inlined_call_operand.vmem [shape: bf16[2,32,64], index: 10, kind: input, shape index: {}]   ;;  %s3679_s11 = inlined_call_operand.hbm [shape: f32[2,1,64], index: 11, kind: input, shape index: {}]   ;;  %s3680_s12 = inlined_call_operand.vmem [shape: bf16[2,64,32], index: 12, kind: input, shape index: {}]   ;;  %s3681_s13 = inlined_call_operand.hbm [shape: f32[2,1,32], index: 13, kind: input, shape index: {}]   ;;  %s3682_s14 = inlined_call_operand.vmem [shape: f32[2,1,32], index: 14, kind: input, shape index: {}]   ;;  %s3683_s15 = inlined_call_operand.vmem [shape: f32[2,1,32], index: 15, kind: input, shape index: {}]   ;;  %s3684_s16 = inlined_call_operand.vmem [shape: bf16[32,128], index: 16, kind: input, shape index: {}]   ;;  %s3685_s17 = inlined_call_operand.vmem [shape: f32[1,128], index: 17, kind: input, shape index: {}]   ;;  %s3686_s18 = inlined_call_operand.hbm [shape: f32[2,128], index: 18, kind: output, shape index: {}]  }
   0x1   :  { %3710 = sst [smem:[#allocation31_spill]] %s3668_s0 }
   0x2   :  { %3711 = sst [smem:[#allocation32_spill]] %s3669_s1 }
   0x3   :  { %3712 = sst [smem:[#allocation33_spill]] %s3670_s2 }
   0x4   :  { %3713 = sst [smem:[#allocation34_spill]] %s3671_s3 }
   0x5   :  { %3714 = sst [smem:[#allocation35_spill]] %s3672_s4 }
   0x6   :  { %3715 = sst [smem:[#allocation36_spill]] %s3673_s5 }
   0x7   :  { %3716 = sst [smem:[#allocation37_spill]] %s3674_s6 }
   0x8   :  { %3717 = sst [smem:[#allocation38_spill]] %s3676_s8 }
   0x9   :  { %3718 = sst [smem:[#allocation39_spill]] %s3678_s10 }
   0xa   :  { %3719 = sst [smem:[#allocation40_spill]] %s3679_s11 }
   0xb   :  { %3720 = sst [smem:[#allocation41_spill]] %s3680_s12 }
   0xc   :  { %3721 = sst [smem:[#allocation42_spill]] %s3682_s14 }
   0xd   :  { %3722 = sst [smem:[#allocation43_spill]] %s3683_s15 }
   0xe   :  { %3723 = sst [smem:[#allocation44_spill]] %s3684_s16 }
   0xf   :  { %3724 = sst [smem:[#allocation45_spill]] %s3685_s17 }
  0x10   :  { %3725 = sst [smem:[#allocation46_spill]] %s3686_s18 }
  0x11   :  { %23 = vsyncpa [#allocation4], 0 }
  0x12   :  { %24 = vsyncpa [#allocation7], 0 }
  0x13   :  { %25 = vsyncpa [#allocation10], 0 }
  0x14   :  { %27 = vsyncpa [#allocation10 + $0x1], 0 }
  0x15   :  { %28 = vsyncpa [#allocation13], 0 }
  0x16   :  { %30 = vsyncpa [#allocation13 + $0x1], 0 }
  0x17   :  { %31 = vsyncpa [#allocation16], 0 }
  0x18   :  { %33 = vsyncpa [#allocation16 + $0x1], 0 }
  0x19   :  { %34 = vsyncpa [#allocation5], 0  ;;  %s3071_s27 = smov 0   ;;  %s3073_s28 = smov 0  }
  0x1a   :  { %s3075_s29 = smov 0   ;;  %s3077_s30 = smov 0  }
  0x1b   :  { %s3079_s0 = smov 0   ;;  %s3081_s19 = smov 0  }
  0x1c LB: > { %3726 = sst [smem:[#allocation25_spill]] %s2939_s29  ;;  %s3100_s1 = sadd.s32 4294967295, %s2951_s19   ;;  %s2951_s19 = sphi %s3081_s19, %s40_s19   ;;  %s2947_s0 = sphi %s3079_s0, %s3794_s0   ;;  %s2943_s30 = sphi %s3077_s30, %s3790_s30   ;;  %s2939_s29 = sphi %s3075_s29, %s3789_s29   ;;  %s2935_s28 = sphi %s3073_s28, %s3793_s28   ;;  %s2931_s27 = sphi %s3071_s27, %s3792_s27  }
  0x1d   : > { %3727 = sst [smem:[#allocation26_spill]] %s2943_s30  ;;  %p186_p0 = scmp.ne.s32.totalorder %s2939_s29, %s2935_s28 }
  0x1e   : > { %3728 = sst [smem:[#allocation27_spill]] %s2947_s0  ;;  %p187_p1 = scmp.eq.s32.totalorder %s2951_s19, 0 }
  0x1f   : > { %3729 = sst [smem:[#allocation28_spill]] %s2951_s19  ;;  %p192_p2 = scmp.ne.s32.totalorder %s2935_s28, %s2931_s27 }
  0x20   : > { %p3692_p3 = scmp.eq.s32.totalorder %s3100_s1, 0  ;;  %p188_p4 = por %p187_p1, %p186_p0 }
  0x21   : > { %p2214_p5 = scmp.ge.s32.totalorder %s2951_s19, 1  ;;  %p531_p7 = scmp.lt.s32.totalorder %s2951_s19, 3 }
  0x22   : > { %p3111_p6 = por %p3692_p3, %p192_p2  ;;  %s2953_s2 = smov [#allocation6]  }
  0x23   : > { %p3116_p8 = pnand %p2214_p5, %p531_p7  ;;  %s562_s23 = sshll.u32 %s2953_s2, 4  ;;  %s563_s23 = int_to_ptr.vmem [resolvable:$true] %s562_s23 }
  0x24   : > { %s3730_s21 = scalar_select %p3111_p6, 1, 0 }
  0x25   : > { %s3731_s22 = scalar_select %p3116_p8, 1, 0 }
  0x26   : > { %p2437_p9 = pneg %p3116_p8  ;;  %p2469_p10 = scmp.lt.s32.totalorder %s2951_s19, 2 }
  0x27   : > { %s3124_s24 = sand.u32 1, %s2951_s19   ;;  %s3734_s18 = sld [smem:[#allocation32_spill]] }
  0x28   : > { %p3128_p11 = pnand %p2437_p9, %p3692_p3  ;;  %p3132_p12 = pnand %p2469_p10, %p188_p4 }
  0x2a   : > { %s3732_s25 = scalar_select %p3128_p11, 1, 0 }
  0x2b   : > { %s3733_s26 = scalar_select %p3132_p12, 1, 0 }
  0x2c   : > { %p3144_p0 = pneg %p3128_p11 }
  0x2d   : > { %s2591_s2 = scalar_lea.hbm %s3734_s18, 32 }
  0x2e   : > { %p2592_p13 = scmp.ne.s32.totalorder %s3734_s18, %s2591_s2  ;;  %p2598_p4 = scmp.lt.u32.totalorder %s2591_s2, %s3734_s18 }
  0x2f   : > { %s3735_s19 = scalar_select %p3144_p0, 1, 0 }
  0x30   : > { %p2594_p1 = pnand %p3144_p0, %p2592_p13 }
  0x32   : > { %p2595_p2 = pneg %p2594_p1 }
  0x34   : > { %p2600_p5 = pnand %p2598_p4, %p2595_p2 }
  0x36   : > { %2603 = shalt.err (!%p2600_p5)
}
  0x37   : > { %s2604_s20 = scalar_lea.vmem %s563_s23, 32  ;;  %p2612_p3 = scmp.lt.s32.totalorder %s563_s23, %s563_s23 }
  0x38   : > { %p2605_p7 = scmp.ne.s32.totalorder %s563_s23, %s2604_s20  ;;  %p2613_p6 = scmp.lt.s32.totalorder %s2604_s20, %s2604_s20 }
  0x3a   : > { %p2607_p9 = pnand %p2605_p7, %p3144_p0  ;;  %p2614_p8 = por %p2613_p6, %p2612_p3 }
  0x3c   : > { %p2608_p10 = pneg %p2607_p9 }
  0x3e   : > { %p2615_p12 = pnand %p2614_p8, %p2608_p10 }
  0x40   : > { %2618 = shalt.err (!%p2615_p12)
}
  0x41   : > { %2443 = dma.hbm_to_vmem [thread:$0]  (!%p3128_p11), %s3734_s18, 32, %s563_s23, [#allocation7]  }
  0x42   : > { %s49_s14 = sadd.s32 1, %s2947_s0  ;;  %s3162_s15 = sand.u32 1, %s2939_s29  }
  0x43   : > { %p50_p13 = scmp.ge.s32.totalorder %s49_s14, 2  ;;  %s3165_s27 = sshll.u32 %s2947_s0, 4 }
  0x44   : > { %s604_s2 = scalar_lea.vmem [#allocation9], %s3162_s15  ;;  %s3737_s5 = sld [smem:[#allocation36_spill]] }
  0x45   : > { %s611_s20 = sshll.u32 %s604_s2, 4  ;;  %s3796_s14 = smov (%p50_p13, %s49_s14), 0  ;;  %s3176_s20 = int_to_ptr.vmem [resolvable:$true] %s611_s20 }
  0x46   : > { %3736 = sst [smem:[#allocation29_spill]] %s3796_s14  ;;  %s176_s23 = ssub.s32 %s2947_s0, %s3796_s14 }
  0x47   : > { %p3180_p3 = scmp.eq.s32.totalorder %s176_s23, 0  ;;  %p3739_p8 = scmp.ne.s32.totalorder %s3733_s26, 0 }
  0x49   : > { %s3738_s18 = scalar_select %p3180_p3, 1, 0 }
  0x4a   : > { %s3174_s12 = scalar_lea.hbm %s3737_s5, %s3165_s27  ;;  %p3189_p12 = pneg %p3739_p8 }
  0x4b   : > { %s2619_s10 = scalar_lea.hbm %s3174_s12, 16  ;;  %s2624_s14 = scalar_lea.hbm %s3737_s5, 32 }
  0x4c   : > { %p2620_p6 = scmp.ne.s32.totalorder %s3174_s12, %s2619_s10  ;;  %p2625_p4 = scmp.lt.u32.totalorder %s3174_s12, %s3737_s5 }
  0x4d   : > { %s3740_s16 = scalar_select %p3189_p12, 1, 0 }
  0x4e   : > { %p2622_p1 = pnand %p3189_p12, %p2620_p6  ;;  %p2626_p5 = scmp.lt.u32.totalorder %s2624_s14, %s2619_s10 }
  0x4f   : > { %p2628_p9 = scmp.lt.u32.totalorder %s2619_s10, %s3174_s12 }
  0x50   : > { %p2623_p2 = pneg %p2622_p1  ;;  %p2627_p7 = por %p2626_p5, %p2625_p4 }
  0x52   : > { %p2629_p10 = por %p2628_p9, %p2627_p7 }
  0x54   : > { %p2630_p13 = pnand %p2629_p10, %p2623_p2 }
  0x56   : > { %2633 = shalt.err (!%p2630_p13)
}
  0x57   : > { %s2634_s2 = scalar_lea.vmem %s3176_s20, 16  ;;  %s2954_s6 = smov [#allocation9]  }
  0x58   : > { %p2635_p6 = scmp.ne.s32.totalorder %s3176_s20, %s2634_s2  ;;  %s2639_s17 = sshll.u32 %s2954_s6, 4  ;;  %s2640_s17 = int_to_ptr.vmem [resolvable:$false] %s2639_s17 }
  0x59   : > { %s2641_s0 = scalar_lea.vmem %s2640_s17, 32  ;;  %p2642_p0 = scmp.lt.s32.totalorder %s3176_s20, %s2640_s17 }
  0x5a   : > { %p2637_p1 = pnand %p2635_p6, %p3189_p12  ;;  %p2643_p3 = scmp.lt.s32.totalorder %s2641_s0, %s2634_s2 }
  0x5c   : > { %p2638_p11 = pneg %p2637_p1  ;;  %p2644_p4 = por %p2643_p3, %p2642_p0 }
  0x5e   : > { %p2645_p5 = pnand %p2644_p4, %p2638_p11 }
  0x60   : > { %2648 = shalt.err (!%p2645_p5)
}
  0x61   : > { %s3741_s10 = scalar_lea.sflag [#allocation10], %s3124_s24  ;;  %s3742_s14 = sadd.s32 1, %s2939_s29 }
  0x62   : > { %2450 = dma.hbm_to_vmem [thread:$0]  (!%p3739_p8), %s3174_s12, 16, %s3176_s20, %s3741_s10  }
  0x63   : > { %p3743_p2 = scmp.ne.s32.totalorder %s3738_s18, 0  ;;  %s3745_s8 = sld [smem:[#allocation38_spill]] }
  0x64   : > { %s646_s0 = scalar_lea.vmem [#allocation12], %s3162_s15  ;;  %s3705_s4 = scalar_lea.sflag [#allocation13], %s3124_s24 }
  0x65   : > { %s3219_s2 = scalar_select %p3743_p2, %s2939_s29, %s3742_s14  }
  0x66   : > { %s653_s5 = sshll.u32 %s646_s0, 4  ;;  %s654_s5 = int_to_ptr.vmem [resolvable:$true] %s653_s5 }
  0x67   : > { %3744 = sst [smem:[#allocation30_spill]] %s3219_s2 }
  0x69   : > { %s3225_s17 = scalar_lea.hbm %s3745_s8, %s3165_s27  ;;  %s2654_s20 = scalar_lea.hbm %s3745_s8, 32 }
  0x6a   : > { %s2649_s30 = scalar_lea.hbm %s3225_s17, 16  ;;  %p2655_p7 = scmp.lt.u32.totalorder %s3225_s17, %s3745_s8 }
  0x6b   : > { %p2650_p11 = scmp.ne.s32.totalorder %s3225_s17, %s2649_s30  ;;  %p2656_p9 = scmp.lt.u32.totalorder %s2654_s20, %s2649_s30 }
  0x6c   : > { %p2658_p13 = scmp.lt.u32.totalorder %s2649_s30, %s3225_s17 }
  0x6d   : > { %p2652_p0 = pnand %p2650_p11, %p3189_p12  ;;  %p2657_p10 = por %p2656_p9, %p2655_p7 }
  0x6f   : > { %p2653_p3 = pneg %p2652_p0  ;;  %p2659_p6 = por %p2658_p13, %p2657_p10 }
  0x71   : > { %p2660_p1 = pnand %p2659_p6, %p2653_p3 }
  0x73   : > { %2663 = shalt.err (!%p2660_p1)
}
  0x74   : > { %s2664_s23 = scalar_lea.vmem %s654_s5, 16  ;;  %s2955_s6 = smov [#allocation12]  }
  0x75   : > { %p2665_p4 = scmp.ne.s32.totalorder %s654_s5, %s2664_s23  ;;  %s2669_s0 = sshll.u32 %s2955_s6, 4  ;;  %s2670_s0 = int_to_ptr.vmem [resolvable:$false] %s2669_s0 }
  0x76   : > { %s2671_s12 = scalar_lea.vmem %s2670_s0, 32  ;;  %p2672_p11 = scmp.lt.s32.totalorder %s654_s5, %s2670_s0 }
  0x77   : > { %p2667_p5 = pnand %p2665_p4, %p3189_p12  ;;  %p2673_p0 = scmp.lt.s32.totalorder %s2671_s12, %s2664_s23 }
  0x79   : > { %p2668_p2 = pneg %p2667_p5  ;;  %p2674_p8 = por %p2673_p0, %p2672_p11 }
  0x7b   : > { %p2675_p7 = pnand %p2674_p8, %p2668_p2 }
  0x7d   : > { %2678 = shalt.err (!%p2675_p7)
}
  0x7e   : > { %p3746_p9 = scmp.ne.s32.totalorder %s3733_s26, 0  ;;  %s3747_s11 = sld [smem:[#allocation40_spill]] }
  0x7f   : > { %s688_s10 = scalar_lea.vmem [#allocation15], %s3162_s15  ;;  %s3706_s23 = scalar_lea.sflag [#allocation16], %s3124_s24 }
  0x80   : > { %2456 = dma.hbm_to_vmem [thread:$0]  (!%p3746_p9), %s3225_s17, 16, %s654_s5, %s3705_s4  }
  0x81   : > { %s695_s14 = sshll.u32 %s688_s10, 4  ;;  %s696_s14 = int_to_ptr.vmem [resolvable:$true] %s695_s14 }
  0x84   : > { %s3252_s20 = scalar_lea.hbm %s3747_s11, %s3165_s27  ;;  %s2684_s17 = scalar_lea.hbm %s3747_s11, 32 }
  0x85   : > { %s2679_s6 = scalar_lea.hbm %s3252_s20, 16  ;;  %p2685_p13 = scmp.lt.u32.totalorder %s3252_s20, %s3747_s11 }
  0x86   : > { %p2680_p8 = scmp.ne.s32.totalorder %s3252_s20, %s2679_s6  ;;  %p2686_p6 = scmp.lt.u32.totalorder %s2684_s17, %s2679_s6 }
  0x87   : > { %p2688_p4 = scmp.lt.u32.totalorder %s2679_s6, %s3252_s20 }
  0x88   : > { %p2682_p3 = pnand %p2680_p8, %p3189_p12  ;;  %p2687_p1 = por %p2686_p6, %p2685_p13 }
  0x8a   : > { %p2683_p10 = pneg %p2682_p3  ;;  %p2689_p5 = por %p2688_p4, %p2687_p1 }
  0x8c   : > { %p2690_p2 = pnand %p2689_p5, %p2683_p10 }
  0x8e   : > { %2693 = shalt.err (!%p2690_p2)
}
  0x8f   : > { %s2694_s18 = scalar_lea.vmem %s696_s14, 16  ;;  %s2956_s10 = smov [#allocation15]  }
  0x90   : > { %p2695_p11 = scmp.ne.s32.totalorder %s696_s14, %s2694_s18  ;;  %s2699_s4 = sshll.u32 %s2956_s10, 4  ;;  %s2700_s4 = int_to_ptr.vmem [resolvable:$false] %s2699_s4 }
  0x91   : > { %s2701_s0 = scalar_lea.vmem %s2700_s4, 32  ;;  %p2702_p8 = scmp.lt.s32.totalorder %s696_s14, %s2700_s4 }
  0x92   : > { %p2697_p0 = pnand %p2695_p11, %p3189_p12  ;;  %p2703_p3 = scmp.lt.s32.totalorder %s2701_s0, %s2694_s18 }
  0x94   : > { %p2698_p7 = pneg %p2697_p0  ;;  %p2704_p9 = por %p2703_p3, %p2702_p8 }
  0x96   : > { %p2705_p6 = pnand %p2704_p9, %p2698_p7 }
  0x98   : > { %2708 = shalt.err (!%p2705_p6)
}
  0x99   : > { %p3748_p13 = scmp.ne.s32.totalorder %s3733_s26, 0  ;;  %s2957_s6 = smov [#allocation3]  }
  0x9a   : > { %s546_s5 = sshll.u32 %s2957_s6, 4  ;;  %s3749_s30 = sld [smem:[#allocation31_spill]]  ;;  %s547_s5 = int_to_ptr.vmem [resolvable:$true] %s546_s5 }
  0x9b   : > { %2462 = dma.hbm_to_vmem [thread:$0]  (!%p3748_p13), %s3252_s20, 16, %s696_s14, %s3706_s23  }
  0x9c   : > { %p3751_p9 = scmp.ne.s32.totalorder %s3735_s19, 0 }
  0xa0   : > { %s3750_s10 = smov %s3749_s30  ;;  %s2709_s8 = scalar_lea.hbm %s3749_s30, 256 }
  0xa1   : > { %p2710_p10 = scmp.ne.s32.totalorder %s3750_s10, %s2709_s8  ;;  %p2716_p5 = scmp.lt.u32.totalorder %s2709_s8, %s3750_s10 }
  0xa3   : > { %p2712_p1 = pnand %p2710_p10, %p3751_p9 }
  0xa5   : > { %p2713_p4 = pneg %p2712_p1 }
  0xa7   : > { %p2718_p2 = pnand %p2716_p5, %p2713_p4 }
  0xa9   : > { %2721 = shalt.err (!%p2718_p2)
}
  0xaa   : > { %s2722_s20 = scalar_lea.vmem %s547_s5, 256  ;;  %p2730_p8 = scmp.lt.s32.totalorder %s547_s5, %s547_s5 }
  0xab   : > { %p2723_p11 = scmp.ne.s32.totalorder %s547_s5, %s2722_s20  ;;  %p2731_p3 = scmp.lt.s32.totalorder %s2722_s20, %s2722_s20 }
  0xad   : > { %p2725_p0 = pnand %p2723_p11, %p3751_p9  ;;  %p2732_p6 = por %p2731_p3, %p2730_p8 }
  0xaf   : > { %p2726_p7 = pneg %p2725_p0 }
  0xb1   : > { %p2733_p13 = pnand %p2732_p6, %p2726_p7 }
  0xb3   : > { %2736 = shalt.err (!%p2733_p13)
}
  0xb4   : > { %s2958_s11 = smov 128   ;;  %s2959_s14 = smov 8  }
  0xb5   : > { %p3752_p10 = scmp.ne.s32.totalorder %s3732_s25, 0  ;;  %s2960_s17 = smov [#allocation8]  }
  0xb6   : > { %s576_s12 = sshll.u32 %s2960_s17, 4  ;;  %s3297_s18 = scalar_lea.hbm %s3675_s7, %s3165_s27  ;;  %s577_s12 = int_to_ptr.vmem [resolvable:$true] %s576_s12 }
  0xb7   : > { %2440 = dma.hbm_to_vmem [thread:$0]  (!%p3752_p10), %s3750_s10, 256, %s547_s5, [#allocation4], %s2958_s11, %s2958_s11, %s2959_s14  }
  0xb8   : > { %s3753_s3 = sld [smem:[#allocation34_spill]] }
  0xbe   : > { %s2737_s23 = scalar_lea.hbm %s3753_s3, 16 }
  0xbf   : > { %p2738_p13 = scmp.ne.s32.totalorder %s3753_s3, %s2737_s23  ;;  %p2744_p5 = scmp.lt.u32.totalorder %s2737_s23, %s3753_s3 }
  0xc1   : > { %p2740_p1 = pnand %p2738_p13, %p3751_p9 }
  0xc3   : > { %p2741_p4 = pneg %p2740_p1 }
  0xc5   : > { %p2746_p2 = pnand %p2744_p5, %p2741_p4 }
  0xc7   : > { %2749 = shalt.err (!%p2746_p2)
}
  0xc8   : > { %s2750_s14 = scalar_lea.vmem %s577_s12, 16  ;;  %s2757_s8 = scalar_lea.vmem %s577_s12, 32 }
  0xc9   : > { %p2751_p11 = scmp.ne.s32.totalorder %s577_s12, %s2750_s14  ;;  %p2758_p8 = scmp.lt.s32.totalorder %s577_s12, %s577_s12 }
  0xca   : > { %p2759_p3 = scmp.lt.s32.totalorder %s2757_s8, %s2750_s14 }
  0xcb   : > { %p2753_p0 = pnand %p2751_p11, %p3751_p9 }
  0xcc   : > { %p2760_p6 = por %p2759_p3, %p2758_p8 }
  0xcd   : > { %p2754_p7 = pneg %p2753_p0 }
  0xcf   : > { %p2761_p12 = pnand %p2760_p6, %p2754_p7 }
  0xd1   : > { %2764 = shalt.err (!%p2761_p12)
}
  0xd2   : > { %2446 = dma.hbm_to_vmem [thread:$0]  (!%p3752_p10), %s3753_s3, 16, %s577_s12, [#allocation7]  }
  0xd3   : > { %s629_s19 = scalar_lea.vmem [#allocation11], %s3162_s15  ;;  %s3322_s30 = scalar_lea.hbm %s3677_s9, %s3165_s27 }
  0xd4   : > { %s636_s23 = sshll.u32 %s629_s19, 4  ;;  %s2765_s25 = scalar_lea.hbm %s3297_s18, 16  ;;  %s637_s23 = int_to_ptr.vmem [resolvable:$true] %s636_s23 }
  0xd5   : > { %p2766_p12 = scmp.ne.s32.totalorder %s3297_s18, %s2765_s25  ;;  %p3754_p9 = scmp.ne.s32.totalorder %s3740_s16, 0 }
  0xd6   : > { %s2770_s20 = scalar_lea.hbm %s3675_s7, 32  ;;  %p2771_p10 = scmp.lt.u32.totalorder %s3297_s18, %s3675_s7 }
  0xd7   : > { %p2768_p13 = pnand %p2766_p12, %p3754_p9  ;;  %p2772_p4 = scmp.lt.u32.totalorder %s2770_s20, %s2765_s25 }
  0xd8   : > { %p2774_p2 = scmp.lt.u32.totalorder %s2765_s25, %s3297_s18 }
  0xd9   : > { %p2769_p1 = pneg %p2768_p13  ;;  %p2773_p5 = por %p2772_p4, %p2771_p10 }
  0xdb   : > { %p2775_p11 = por %p2774_p2, %p2773_p5 }
  0xdd   : > { %p2776_p0 = pnand %p2775_p11, %p2769_p1 }
  0xdf   : > { %2779 = shalt.err (!%p2776_p0)
}
  0xe0   : > { %s2780_s12 = scalar_lea.vmem %s637_s23, 16  ;;  %s2961_s14 = smov [#allocation11]  }
  0xe1   : > { %p2781_p7 = scmp.ne.s32.totalorder %s637_s23, %s2780_s12  ;;  %s2785_s8 = sshll.u32 %s2961_s14, 4  ;;  %s2786_s8 = int_to_ptr.vmem [resolvable:$false] %s2785_s8 }
  0xe2   : > { %s2787_s29 = scalar_lea.vmem %s2786_s8, 32  ;;  %p2788_p6 = scmp.lt.s32.totalorder %s637_s23, %s2786_s8 }
  0xe3   : > { %p2783_p8 = pnand %p2781_p7, %p3754_p9  ;;  %p2789_p12 = scmp.lt.s32.totalorder %s2787_s29, %s2780_s12 }
  0xe5   : > { %p2784_p3 = pneg %p2783_p8  ;;  %p2790_p13 = por %p2789_p12, %p2788_p6 }
  0xe7   : > { %p2791_p4 = pnand %p2790_p13, %p2784_p3 }
  0xe9   : > { %2794 = shalt.err (!%p2791_p4)
}
  0xea   : > { %p3755_p10 = scmp.ne.s32.totalorder %s3733_s26, 0  ;;  %s3756_s2 = scalar_lea.sflag [#allocation10], %s3124_s24 }
  0xeb   : > { %s663_s19 = scalar_lea.vmem [#allocation14], %s3162_s15  ;;  %s3348_s4 = scalar_lea.hbm %s3681_s13, %s3165_s27 }
  0xec   : > { %2453 = dma.hbm_to_vmem [thread:$0]  (!%p3755_p10), %s3297_s18, 16, %s637_s23, %s3756_s2  }
  0xed   : > { %s670_s6 = sshll.u32 %s663_s19, 4  ;;  %s2795_s0 = scalar_lea.hbm %s3322_s30, 16  ;;  %s671_s6 = int_to_ptr.vmem [resolvable:$true] %s670_s6 }
  0xee   : > { %p2796_p1 = scmp.ne.s32.totalorder %s3322_s30, %s2795_s0  ;;  %s2800_s11 = scalar_lea.hbm %s3677_s9, 32 }
  0xef   : > { %p2801_p11 = scmp.lt.u32.totalorder %s3322_s30, %s3677_s9  ;;  %p2802_p0 = scmp.lt.u32.totalorder %s2800_s11, %s2795_s0 }
  0xf0   : > { %p2798_p5 = pnand %p2796_p1, %p3754_p9  ;;  %p2804_p8 = scmp.lt.u32.totalorder %s2795_s0, %s3322_s30 }
  0xf1   : > { %p2803_p7 = por %p2802_p0, %p2801_p11 }
  0xf2   : > { %p2799_p2 = pneg %p2798_p5 }
  0xf3   : > { %p2805_p3 = por %p2804_p8, %p2803_p7 }
  0xf5   : > { %p2806_p6 = pnand %p2805_p3, %p2799_p2 }
  0xf7   : > { %2809 = shalt.err (!%p2806_p6)
}
  0xf8   : > { %s2810_s27 = scalar_lea.vmem %s671_s6, 16  ;;  %s2962_s18 = smov [#allocation14]  }
  0xf9   : > { %p2811_p12 = scmp.ne.s32.totalorder %s671_s6, %s2810_s27  ;;  %s2815_s23 = sshll.u32 %s2962_s18, 4  ;;  %s2816_s23 = int_to_ptr.vmem [resolvable:$false] %s2815_s23 }
  0xfa   : > { %s2817_s8 = scalar_lea.vmem %s2816_s23, 32  ;;  %p2818_p1 = scmp.lt.s32.totalorder %s671_s6, %s2816_s23 }
  0xfb   : > { %p2813_p13 = pnand %p2811_p12, %p3754_p9  ;;  %p2819_p5 = scmp.lt.s32.totalorder %s2817_s8, %s2810_s27 }
  0xfd   : > { %p2814_p4 = pneg %p2813_p13  ;;  %p2820_p10 = por %p2819_p5, %p2818_p1 }
  0xff   : > { %p2821_p0 = pnand %p2820_p10, %p2814_p4 }
 0x101   : > { %2824 = shalt.err (!%p2821_p0)
}
 0x102   : > { %p3757_p11 = scmp.ne.s32.totalorder %s3733_s26, 0  ;;  %s3758_s29 = scalar_lea.sflag [#allocation13], %s3124_s24 }
 0x103   : > { %s713_s2 = scalar_lea.vmem [#allocation17], %s3162_s15  ;;  %s2825_s17 = scalar_lea.hbm %s3348_s4, 16 }
 0x104   : > { %2459 = dma.hbm_to_vmem [thread:$0]  (!%p3757_p11), %s3322_s30, 16, %s671_s6, %s3758_s29  }
 0x105   : > { %s720_s19 = sshll.u32 %s713_s2, 4  ;;  %p2826_p2 = scmp.ne.s32.totalorder %s3348_s4, %s2825_s17  ;;  %s721_s19 = int_to_ptr.vmem [resolvable:$true] %s720_s19 }
 0x106   : > { %s2830_s20 = scalar_lea.hbm %s3681_s13, 32  ;;  %p2831_p8 = scmp.lt.u32.totalorder %s3348_s4, %s3681_s13 }
 0x107   : > { %p2828_p10 = pnand %p2826_p2, %p3754_p9  ;;  %p2832_p3 = scmp.lt.u32.totalorder %s2830_s20, %s2825_s17 }
 0x108   : > { %p2834_p12 = scmp.lt.u32.totalorder %s2825_s17, %s3348_s4 }
 0x109   : > { %p2829_p7 = pneg %p2828_p10  ;;  %p2833_p6 = por %p2832_p3, %p2831_p8 }
 0x10b   : > { %p2835_p13 = por %p2834_p12, %p2833_p6 }
 0x10d   : > { %p2836_p4 = pnand %p2835_p13, %p2829_p7 }
 0x10f   : > { %2839 = shalt.err (!%p2836_p4)
}
 0x110   : > { %s2840_s15 = scalar_lea.vmem %s721_s19, 16  ;;  %s2963_s30 = smov [#allocation17]  }
 0x111   : > { %p2841_p1 = scmp.ne.s32.totalorder %s721_s19, %s2840_s15  ;;  %s2845_s6 = sshll.u32 %s2963_s30, 4  ;;  %s2846_s6 = int_to_ptr.vmem [resolvable:$false] %s2845_s6 }
 0x112   : > { %s2847_s12 = scalar_lea.vmem %s2846_s6, 32  ;;  %p2848_p2 = scmp.lt.s32.totalorder %s721_s19, %s2846_s6 }
 0x113   : > { %p2843_p5 = pnand %p2841_p1, %p3754_p9  ;;  %p2849_p10 = scmp.lt.s32.totalorder %s2847_s12, %s2840_s15 }
 0x115   : > { %p2844_p0 = pneg %p2843_p5  ;;  %p2850_p11 = por %p2849_p10, %p2848_p2 }
 0x117   : > { %p2851_p3 = pnand %p2850_p11, %p2844_p0 }
 0x119   : > { %2854 = shalt.err (!%p2851_p3)
}
 0x11a   : > { %p3759_p8 = scmp.ne.s32.totalorder %s3733_s26, 0  ;;  %s3760_s14 = scalar_lea.sflag [#allocation16], %s3124_s24 }
 0x11b   : > { %p3761_p7 = scmp.ne.s32.totalorder %s3731_s22, 0 }
 0x11c   : > { %2465 = dma.hbm_to_vmem [thread:$0]  (!%p3759_p8), %s3348_s4, 16, %s721_s19, %s3760_s14  }
 0x11d   : > { %741 = sbr.rel (%p3761_p7) target bundleno = 4110 (0x100e), region = 92  ;;  %p3762_p9 = scmp.eq.s32.totalorder (!%p3761_p7), %s3100_s1, 0 }
 0x124   : > { %2906 = dma.done.wait (%p3762_p9), [#allocation4], 256   ;;  %p3763_p6 = pmov %p3762_p9 }
 0x126   : > { %2908 = vsyncadd (%p3763_p6), [#allocation4], 4294967040  ;;  %p3764_p12 = pmov %p3763_p6 }
 0x127   : > { %p3765_p11 = pmov %p3763_p6 }
 0x128   : > { %2910 = dma.done.wait (%p3764_p12), [#allocation7], 48  }
 0x129   : > { %2912 = vsyncadd (%p3765_p11), [#allocation7], 4294967248  ;;  %s755_s24 = sand.u32 1, %s3100_s1   ;;  %s3401_s26 = sand.u32 1, %s2935_s28  }
 0x12a   : > { %s756_s22 = scalar_lea.sflag [#allocation10], %s755_s24  ;;  %p3766_p13 = scmp.ne.s32.totalorder %s3730_s21, 0 }
 0x12c   : > { %2914 = dma.done.wait (%p3766_p13), %s756_s22, 32  }
 0x12d   : > { %2916 = vsyncadd (%p3766_p13), %s756_s22, 4294967264  ;;  %s772_s27 = scalar_lea.sflag [#allocation13], %s755_s24 }
 0x12e   : > { %2918 = dma.done.wait (%p3766_p13), %s772_s27, 32  }
 0x12f   : > { %2920 = vsyncadd (%p3766_p13), %s772_s27, 4294967264  ;;  %s788_s8 = scalar_lea.sflag [#allocation16], %s755_s24 }
 0x130   : > { %2922 = dma.done.wait (%p3766_p13), %s788_s8, 32  }
 0x131   : > { %2924 = vsyncadd (%p3766_p13), %s788_s8, 4294967264  ;;  %s3767_s2 = sld [smem:[#allocation26_spill]]  ;;  %s3768_s5 = sld [smem:[#allocation35_spill]] }
 0x132   : > { %s3769_s30 = sld [smem:[#allocation37_spill]]  ;;  %s3770_s24 = sld [smem:[#allocation39_spill]] }
 0x133   : > { %s3771_s29 = sld [smem:[#allocation41_spill]]  ;;  %s3772_s0 = sld [smem:[#allocation42_spill]] }
 0x134   : > { %s3773_s3 = sld [smem:[#allocation43_spill]]  ;;  %s798_s21 = scalar_lea.vmem [#allocation17], %s3401_s26 }
 0x137   : > { %p892_p4 = scmp.lt.s32.totalorder %s3767_s2, 1  ;;  %p2237_p1 = scmp.ne.s32.totalorder %s3767_s2, 0 }
 0x138   : > { %v923_v0 = vld [vmem:[#allocation3] sm:$0xff] (!%p2237_p1)  ;;  %vm927_vm0 = vcmask (!%p2237_p1), 261120   ;;  %v924_v1 = vld [vmem:[#allocation3 + $0x8] sm:$0xff] (!%p2237_p1)  ;;  %s3774_s4 = sld [smem:[#allocation33_spill]] (!%p2237_p1)  ;;  %v2239_v23 = vld [vmem:[#allocation8] ss:$0 sm:$0xff] (!%p2237_p1) }
 0x139   : > { %s3422_s19 = scalar_select %p892_p4, %s3767_s2, 1 }
 0x13a   : > { %922 = sbr.rel (%p2237_p1) target bundleno = 632 (0x278), region = 132  ;;  %v928_v2 = vsel (!%p2237_p1), %vm927_vm0, %v923_v0, 0.0  ;;  %v931_v3 = vsel (!%p2237_p1), %vm927_vm0, %v924_v1, 0.0 }
 0x13b   : > { %s2280_s17 = sshll.u32 %s3422_s19, 4  ;;  %s2283_s25 = sshll.u32 %s3422_s19, 5  ;;  %929 = vadd.xlane.f32.xlu0 (!%p2237_p1), %v928_v2 }
 0x13c   : > { %s3429_s11 = scalar_lea.vmem %s3768_s5, %s2280_s17  ;;  %s3434_s6 = scalar_lea.vmem %s3769_s30, %s2280_s17 }
 0x13d   : > { %s3439_s22 = scalar_lea.vmem %s3770_s24, %s2280_s17  ;;  %s3444_s23 = scalar_lea.vmem %s3771_s29, %s2283_s25 }
 0x13e   : > { %s914_s20 = scalar_lea.vmem %s3772_s0, %s3422_s19  ;;  %s917_s15 = scalar_lea.vmem %s3773_s3, %s3422_s19  ;;  %v2238_v21 = vld [vmem:[%s3774_s4] ss:$0 sm:$0xff] (!%p2237_p1) }
 0x13f   : > { %932 = vadd.xlane.f32.xlu0 (!%p2237_p1), %v931_v3 }
 0x1c8   : > { %v930_v4 = vpop.xlane.xlu0 %929 }
 0x1c9   : > { %v935_v5 = vmul.f32 0.03125, %v930_v4 }
 0x1cb   : > { %v937_v6 = vsub.f32 %v923_v0, %v935_v5 }
 0x1cc   : > { %v933_v7 = vpop.xlane.xlu0 %932 }
 0x1cd   : > { %v936_v8 = vmul.f32 0.03125, %v933_v7  ;;  %v939_v9 = vmul.f32 %v937_v6, %v937_v6 }
 0x1cf   : > { %v938_v10 = vsub.f32 %v924_v1, %v936_v8  ;;  %v941_v11 = vsel %vm927_vm0, %v939_v9, 0.0 }
 0x1d0   : > { %942 = vadd.xlane.f32.xlu1 %v941_v11 }
 0x1d1   : > { %v940_v12 = vmul.f32 %v938_v10, %v938_v10 }
 0x1d3   : > { %v944_v13 = vsel %vm927_vm0, %v940_v12, 0.0 }
 0x1d4   : > { %945 = vadd.xlane.f32.xlu1 %v944_v13 }
 0x25d   : > { %v943_v14 = vpop.xlane.xlu1 %942 }
 0x25e   : > { %v947_v15 = vmul.f32 0.03125, %v943_v14 }
 0x260   : > { %v949_v16 = vadd.f32 1e-05, %v947_v15 }
 0x261   : > { %v946_v17 = vpop.xlane.xlu1 %945 }
 0x262   : > { %2540 = vrsqrt.f32 %v949_v16  ;;  %v948_v18 = vmul.f32 0.03125, %v946_v17 }
 0x264   : > { %v950_v19 = vadd.f32 1e-05, %v948_v18 }
 0x266   : > { %2542 = vrsqrt.f32 %v950_v19 }
 0x26c   : > { %v2541_v20 = vpop.eup %2540 }
 0x26d   : > { %v953_v22 = vmul.f32 %v2541_v20, %v937_v6 }
 0x26f   : > { %v961_v24 = vmul.f32 %v2238_v21, %v953_v22 }
 0x270   : > { %v2543_v25 = vpop.eup %2542 }
 0x271   : > { %v969_v26 = vadd.f32 %v2239_v23, %v961_v24  ;;  %v954_v27 = vmul.f32 %v2543_v25, %v938_v10 }
 0x273   : > { %971 = vst.msk [vmem:[#allocation2] sm:$0xff] %vm927_vm0, %v969_v26  ;;  %v962_v28 = vmul.f32 %v2238_v21, %v954_v27 }
 0x275   : > { %v970_v29 = vadd.f32 %v2239_v23, %v962_v28 }
 0x277   : > { %972 = vst.msk [vmem:[#allocation2 + $0x8] sm:$0xff] %vm927_vm0, %v970_v29 }
 0x278 PF: > { %v2549_v30 = vld [vmem:[%s3429_s11] sm:$0xff]   ;;  %v2964_v31 = vmov 0.0   ;;  %v2550_v32 = vld [vmem:[%s3429_s11 + $0x8] sm:$0xff]   ;;  %vm2965_vm1 = vmmov 0   ;;  %vm999_vm2 = vcmask 261120   ;;  %s3775_s18 = scalar_lea.vmem [#allocation9], %s3401_s26  ;;  %v1057_v51 = vlaneseq }
 0x279   : > { %2317 = vmatprep.subr.bf16.mxu0 %v2964_v31  ;;  %2325 = vmatprep.subr.bf16.mxu1 %v2964_v31  ;;  %v2240_v36 = vld [vmem:[%s3775_s18] ss:$0 sm:$0xff]  ;;  %s2966_s29 = smov 96   ;;  %vm1083_vm3 = vcmask 130048   ;;  %v2967_v49 = vmov 1966171168  }
 0x27a   : > { %2318 = vmatpush3.bf16.msra.mxu0 %v2549_v30  ;;  %2321 = vmatprep.mubr.msk.bf16.mxu0 %vm2965_vm1, %v2964_v31  ;;  %v3471_v33 = vld [vmem:[#allocation2] sm:$0xff]  ;;  %v1055_v50 = vunpack.c.l.s4 %v2967_v49  ;;  %v1058_v53 = vshrl.u32 %v1057_v51, 7  ;;  %vm1179_vm4 = vcmask 64512   ;;  %s2968_s2 = smov 64   ;;  %s2969_s17 = smov 80   ;;  %vm1209_vm5 = vcmask 1043456  }
 0x27b   : > { %2319 = vmatprep.subr.bf16.mxu0 %v2964_v31  ;;  %2327 = vmatprep.mubr.msk.bf16.mxu1 %vm2965_vm1, %v2964_v31  ;;  %v2244_v55 = vld.sshfl [vmem:[#allocation6] sm:$0x11 pattern:$0x75316420]  ;;  %s2970_s25 = smov 112   ;;  %s2971_s11 = smov 48  }
 0x27c   : > { %v1056_v52 = vunpack.c.0.s8 %v1055_v50  ;;  %v1072_v57 = vsub.s32 0, %v1058_v53  ;;  %v1053_v58 = vcombine.high %v2244_v55, %v2244_v55  ;;  %s2972_s30 = smov 16   ;;  %s3777_s12 = scalar_lea.vmem [#allocation12], %s3401_s26  ;;  %vm1772_vm6 = vcmask 523264  }
 0x27d   : > { %s3778_s14 = scalar_lea.vmem [#allocation14], %s3401_s26  ;;  %s3779_s24 = scalar_lea.vmem [#allocation15], %s3401_s26 }
 0x27e   : > { %v3473_v34 = vld [vmem:[#allocation2 + $0x8] sm:$0xff]  ;;  %2320 = vmatpush3.bf16.msra.mxu0 %v2550_v32  ;;  %v1059_v54 = vsub.s32 %v1056_v52, %v1058_v53  ;;  %s3782_s5 = sld [smem:[#allocation26_spill]] }
 0x27f   : > { %v975_v35 = vpack.c.bf16 %v3473_v34, %v3471_v33  ;;  %2331 = vmatprep.subr.bf16.mxu0 %v2964_v31 }
 0x280   : > { %v1060_v56 = vrot.slane %v2244_v55, %v1059_v54  ;;  %v1067_v60 = vrot.slane %v1053_v58, %v1059_v54 }
 0x281   : > { %2322 = vmatmul.mubr.msk.bf16.vlgmr.msra.gmra.mrb[0].mxu0 %vm999_vm2, %v975_v35 }
 0x282   : > { %2333 = vmatprep.mubr.msk.bf16.mxu0 %vm2965_vm1, %v2964_v31  ;;  %v3504_v59 = vrot.slane %v1060_v56, %v1072_v57  ;;  %v3507_v0 = vrot.slane %v1067_v60, %v1072_v57 }
 0x284   : > { %p2271_p5 = scmp.ne.s32.totalorder %s3782_s5, 1 }
 0x285   : > { %s3783_s3 = sld [smem:[#allocation44_spill]] (!%p2271_p5)  ;;  %vm2974_vm7 = vmmov (!%p2271_p5), 0   ;;  %vm1887_vm8 = vcmask (!%p2271_p5), 1041409   ;;  %s3784_s18 = sld [smem:[#allocation45_spill]] (!%p2271_p5)  ;;  %vm1946_vm9 = vcmask (!%p2271_p5), 1041408  }
 0x354   : > { %v1037_v37 = vpop.f32.mrb[0].mxu0 }
 0x355   : > { %v1038_v38 = vadd.f32 %v2240_v36, %v1037_v37  ;;  %v2323_v39 = vpop.f32.mrb[1].mxu0 }
 0x356   : > { %v1040_v40 = vpop.f32.mrb[2].mxu0 }
 0x357   : > { %v3486_v41 = vpack.c.bf16 %v1038_v38, %v1038_v38  ;;  %v1041_v42 = vadd.f32 %v2240_v36, %v1040_v40  ;;  %v2324_v43 = vpop.f32.mrb[3].mxu0 }
 0x359   : > { %1081 = vrot.lane.b32.xlu0 %v3486_v41, %s2966_s29  ;;  %v3489_v44 = vpack.c.bf16 %v1041_v42, %v1041_v42 }
 0x35d   : > { %1131 = vrot.lane.b32.xlu0 %v3489_v44, %s2966_s29 }
 0x3cb   : > { %v1082_v45 = vpop.permute.xlu0 %1081 }
 0x3cc   : > { %v1088_v46 = vsel %vm1083_vm3, %v1082_v45, 0 }
 0x3cd   : > { %2326 = vmatpush3.bf16.xpose.msra.mxu1 %v1088_v46 }
 0x3ce   : > { %2337 = vmatprep.subr.bf16.mxu1 %v2964_v31 }
 0x3cf   : > { %v1132_v47 = vpop.permute.xlu0 %1131 }
 0x3d0   : > { %v1137_v48 = vsel %vm1083_vm3, %v1132_v47, 0 }
 0x3d1   : > { %2332 = vmatpush3.bf16.xpose.msra.mxu0 %v1137_v48 }
 0x3d2   : > { %2343 = vmatprep.subr.bf16.mxu0 %v2964_v31 }
 0x3d4   : > { %2328 = vmatmul.mubr.msk.bf16.vlgmr.msra.gmra.mrb[0].mxu1 %vm1083_vm3, %v3486_v41 }
 0x3d5   : > { %2339 = vmatprep.mubr.msk.bf16.mxu1 %vm2965_vm1, %v2964_v31 }
 0x3d8   : > { %2334 = vmatmul.mubr.msk.bf16.vlgmr.msra.gmra.mrb[4].mxu0 %vm1083_vm3, %v3489_v44 }
 0x3d9   : > { %2345 = vmatprep.mubr.msk.bf16.mxu0 %vm2965_vm1, %v2964_v31 }
 0x4a7   : > { %v1124_v61 = vpop.f32.mrb[0].mxu1 }
 0x4a8   : > { %v1125_v62 = vadd.f32 %v1124_v61, %v3504_v59  ;;  %v2329_v63 = vpop.f32.mrb[1].mxu1 }
 0x4a9   : > { %v1127_v1 = vpop.f32.mrb[2].mxu1 }
 0x4aa   : > { %v2330_v2 = vpop.f32.mrb[3].mxu1  ;;  %v1180_v3 = vsel %vm1179_vm4, %v1125_v62, -inf }
 0x4ab   : > { %1181 = vmax.xlane.f32.xlu1 %v1180_v3  ;;  %v1173_v4 = vpop.f32.mrb[4].mxu0 }
 0x4ac   : > { %v1174_v5 = vadd.f32 %v1173_v4, %v3507_v0  ;;  %v2335_v6 = vpop.f32.mrb[5].mxu0 }
 0x4ad   : > { %v1176_v7 = vpop.f32.mrb[6].mxu0 }
 0x4ae   : > { %v2336_v8 = vpop.f32.mrb[7].mxu0  ;;  %v1183_v9 = vsel %vm1179_vm4, %v1174_v5, -inf }
 0x4af   : > { %1184 = vmax.xlane.f32.xlu1 %v1183_v9 }
 0x4c0   : > { %1204 = vrot.lane.b32.xlu1 %v3486_v41, %s2968_s2 }
 0x4c4   : > { %1253 = vrot.lane.b32.xlu1 %v3489_v44, %s2968_s2 }
 0x4c8   : > { %1303 = vrot.lane.b32.xlu1 %v3486_v41, %s2969_s17 }
 0x538   : > { %v1182_v10 = vpop.xlane.xlu1 %1181 }
 0x539   : > { %v1186_v11 = vsub.f32 %v1125_v62, %v1182_v10 }
 0x53b   : > { %v1188_v12 = vmul.f32 1.442695, %v1186_v11 }
 0x53c   : > { %v1185_v13 = vpop.xlane.xlu1 %1184 }
 0x53d   : > { %2559 = vpow2.f32 %v1188_v12  ;;  %v1187_v14 = vsub.f32 %v1174_v5, %v1185_v13 }
 0x53f   : > { %v1190_v15 = vmul.f32 1.442695, %v1187_v14 }
 0x540   : > { %v1205_v16 = vpop.permute.xlu1 %1204 }
 0x541   : > { %2561 = vpow2.f32 %v1190_v15  ;;  %v1211_v17 = vsel %vm1209_vm5, %v1205_v16, 0 }
 0x542   : > { %2338 = vmatpush3.bf16.msra.mxu1 %v1211_v17 }
 0x543   : > { %2349 = vmatprep.subr.bf16.mxu1 %v2964_v31 }
 0x544   : > { %v1254_v18 = vpop.permute.xlu1 %1253 }
 0x545   : > { %v1259_v19 = vsel %vm1209_vm5, %v1254_v18, 0 }
 0x546   : > { %2344 = vmatpush3.bf16.msra.mxu0 %v1259_v19  ;;  %v2551_v19 = vld [vmem:[%s3434_s6] sm:$0xff]  }
 0x547   : > { %v2560_v20 = vpop.eup %2559  ;;  %2355 = vmatprep.subr.bf16.mxu0 %v2964_v31 }
 0x548   : > { %v1192_v21 = vsel %vm1179_vm4, %v2560_v20, 0.0  ;;  %v1304_v24 = vpop.permute.xlu1 %1303 }
 0x549   : > { %1193 = vadd.xlane.f32.xlu0 %v1192_v21  ;;  %v1309_v32 = vsel %vm1083_vm3, %v1304_v24, 0 }
 0x54b   : > { %v2562_v22 = vpop.eup %2561 }
 0x54c   : > { %v1195_v23 = vsel %vm1179_vm4, %v2562_v22, 0.0 }
 0x54d   : > { %1196 = vadd.xlane.f32.xlu1 %v1195_v23 }
 0x55e   : > { %1353 = vrot.lane.b32.xlu1 %v3489_v44, %s2969_s17 }
 0x55f   : > { %1301 = vrot.lane.b32.xlu0 %v3486_v41, %s2970_s25 }
 0x562   : > { %1351 = vrot.lane.b32.xlu1 %v3489_v44, %s2970_s25 }
 0x5d6   : > { %v1194_v25 = vpop.xlane.xlu0 %1193 }
 0x5d7   : > { %2563 = vrcp.f32 %v1194_v25 }
 0x5da   : > { %v1197_v26 = vpop.xlane.xlu1 %1196  ;;  %v1302_v39 = vpop.permute.xlu0 %1301 }
 0x5db   : > { %2565 = vrcp.f32 %v1197_v26 }
 0x5de   : > { %v1354_v36 = vpop.permute.xlu1 %1353 }
 0x5df   : > { %v1359_v38 = vsel %vm1083_vm3, %v1354_v36, 0 }
 0x5e1   : > { %v2564_v27 = vpop.eup %2563 }
 0x5e2   : > { %v1200_v28 = vmul.f32 %v2564_v27, %v2560_v20  ;;  %v1352_v40 = vpop.permute.xlu1 %1351  ;;  %v2552_v20 = vld [vmem:[%s3434_s6 + $0x8] sm:$0xff]   ;;  %s3776_s6 = scalar_lea.vmem [#allocation11], %s3401_s26 }
 0x5e4   : > { %v1202_v29 = vpack.c.bf16 %v1200_v28, %v1200_v28 }
 0x5e5   : > { %v2566_v30 = vpop.eup %2565 }
 0x5e6   : > { %v1201_v35 = vmul.f32 %v2566_v30, %v2562_v22  ;;  %2340 = vmatmul.mubr.msk.bf16.vlgmr.msra.gmra.mrb[4].mxu1 %vm1179_vm4, %v1202_v29 }
 0x5e7   : > { %2350 = vmatpush3.bf16.xpose.msra.mxu1 %v1309_v32  ;;  %2351 = vmatprep.mubr.msk.bf16.mxu1 %vm2965_vm1, %v2964_v31 }
 0x5e8   : > { %v1203_v37 = vpack.c.bf16 %v1201_v35, %v1201_v35  ;;  %2361 = vmatprep.subr.bf16.mxu1 %v2964_v31 }
 0x5ea   : > { %2346 = vmatmul.mubr.msk.bf16.vlgmr.msra.gmra.mrb[8].mxu0 %vm1179_vm4, %v1203_v37 }
 0x5eb   : > { %2356 = vmatpush3.bf16.xpose.msra.mxu0 %v1359_v38  ;;  %2357 = vmatprep.mubr.msk.bf16.mxu0 %vm2965_vm1, %v2964_v31 }
 0x5ec   : > { %2367 = vmatprep.subr.bf16.mxu0 %v2964_v31 }
 0x5ee   : > { %2352 = vmatmul.mubr.msk.bf16.vlgmr.msra.gmra.mrb[8].mxu1 %vm1083_vm3, %v1302_v39  ;;  %v2253_v39 = vld [vmem:[%s3776_s6] ss:$0 sm:$0xff] }
 0x5ef   : > { %2363 = vmatprep.mubr.msk.bf16.mxu1 %vm2965_vm1, %v2964_v31 }
 0x5f2   : > { %2358 = vmatmul.mubr.msk.bf16.vlgmr.msra.gmra.mrb[12].mxu0 %vm1083_vm3, %v1352_v40 }
 0x5f3   : > { %2369 = vmatprep.mubr.msk.bf16.mxu0 %vm2965_vm1, %v2964_v31 }
 0x6b9   : > { %v3540_v42 = vpop.f32.mrb[4].mxu1 }
 0x6ba   : > { %v2341_v43 = vpop.f32.mrb[5].mxu1 }
 0x6bb   : > { %v1250_v45 = vpop.f32.mrb[6].mxu1 }
 0x6bc   : > { %v2342_v46 = vpop.f32.mrb[7].mxu1 }
 0x6bd   : > { %v3542_v47 = vpop.f32.mrb[8].mxu0 }
 0x6be   : > { %v2347_v48 = vpop.f32.mrb[9].mxu0 }
 0x6bf   : > { %v1298_v49 = vpop.f32.mrb[10].mxu0 }
 0x6c0   : > { %v2348_v50 = vpop.f32.mrb[11].mxu0 }
 0x6c1   : > { %v1345_v51 = vpop.f32.mrb[8].mxu1 }
 0x6c2   : > { %v1346_v52 = vadd.f32 %v1345_v51, %v3504_v59  ;;  %v2353_v53 = vpop.f32.mrb[9].mxu1 }
 0x6c3   : > { %v1348_v54 = vpop.f32.mrb[10].mxu1 }
 0x6c4   : > { %v2354_v55 = vpop.f32.mrb[11].mxu1  ;;  %v1401_v56 = vsel %vm1179_vm4, %v1346_v52, -inf }
 0x6c5   : > { %1402 = vmax.xlane.f32.xlu1 %v1401_v56  ;;  %v1395_v57 = vpop.f32.mrb[12].mxu0 }
 0x6c6   : > { %v1396_v58 = vadd.f32 %v1395_v57, %v3507_v0  ;;  %v2359_v60 = vpop.f32.mrb[13].mxu0 }
 0x6c7   : > { %v1398_v61 = vpop.f32.mrb[14].mxu0 }
 0x6c8   : > { %v2360_v62 = vpop.f32.mrb[15].mxu0  ;;  %v1404_v63 = vsel %vm1179_vm4, %v1396_v58, -inf }
 0x6c9   : > { %1405 = vmax.xlane.f32.xlu0 %v1404_v63  ;;  %v2554_v62 = vld [vmem:[%s3439_s22 + $0x8] sm:$0xff]  }
 0x6df   : > { %1473 = vrot.lane.b32.xlu0 %v3489_v44, %s2971_s11 }
 0x752   : > { %v1403_v1 = vpop.xlane.xlu1 %1402 }
 0x753   : > { %v1407_v59 = vsub.f32 %v1346_v52, %v1403_v1 }
 0x755   : > { %v1409_v2 = vmul.f32 1.442695, %v1407_v59 }
 0x756   : > { %v1406_v3 = vpop.xlane.xlu0 %1405 }
 0x757   : > { %2567 = vpow2.f32 %v1409_v2  ;;  %v1408_v4 = vsub.f32 %v1396_v58, %v1406_v3 }
 0x759   : > { %v1411_v5 = vmul.f32 1.442695, %v1408_v4 }
 0x75a   : > { %v1474_v6 = vpop.permute.xlu0 %1473 }
 0x75b   : > { %2569 = vpow2.f32 %v1411_v5  ;;  %v1479_v0 = vsel %vm1209_vm5, %v1474_v6, 0  ;;  %v2257_v6 = vld [vmem:[%s3777_s12] ss:$0 sm:$0xff] }
 0x75c   : > { %2368 = vmatpush3.bf16.msra.mxu0 %v1479_v0 }
 0x75d   : > { %2381 = vmatprep.subr.bf16.mxu0 %v2964_v31 }
 0x761   : > { %v2568_v7 = vpop.eup %2567 }
 0x762   : > { %v1413_v8 = vsel %vm1179_vm4, %v2568_v7, 0.0 }
 0x763   : > { %1414 = vadd.xlane.f32.xlu1 %v1413_v8 }
 0x765   : > { %v2570_v9 = vpop.eup %2569 }
 0x766   : > { %v1416_v44 = vsel %vm1179_vm4, %v2570_v9, 0.0 }
 0x767   : > { %1417 = vadd.xlane.f32.xlu1 %v1416_v44  ;;  %v2258_v44 = vld [vmem:[%s3778_s14] ss:$0 sm:$0xff] }
 0x778   : > { %1425 = vrot.lane.b32.xlu1 %v3486_v41, %s2971_s11 }
 0x7f0   : > { %v1415_v10 = vpop.xlane.xlu1 %1414 }
 0x7f1   : > { %2571 = vrcp.f32 %v1415_v10 }
 0x7f4   : > { %v1418_v11 = vpop.xlane.xlu1 %1417 }
 0x7f5   : > { %2573 = vrcp.f32 %v1418_v11 }
 0x7f8   : > { %v1426_v12 = vpop.permute.xlu1 %1425 }
 0x7f9   : > { %v1431_v13 = vsel %vm1209_vm5, %v1426_v12, 0 }
 0x7fa   : > { %2362 = vmatpush3.bf16.msra.mxu1 %v1431_v13 }
 0x7fb   : > { %v2572_v14 = vpop.eup %2571  ;;  %2373 = vmatprep.subr.bf16.mxu1 %v2964_v31 }
 0x7fc   : > { %v1421_v15 = vmul.f32 %v2572_v14, %v2568_v7  ;;  %v2555_v14 = vld [vmem:[%s3444_s23] sm:$0xff]  }
 0x7fe   : > { %v1423_v16 = vpack.c.bf16 %v1421_v15, %v1421_v15  ;;  %v2556_v15 = vld [vmem:[%s3444_s23 + $0x8] sm:$0xff]  }
 0x7ff   : > { %v2574_v17 = vpop.eup %2573 }
 0x800   : > { %v1422_v18 = vmul.f32 %v2574_v17, %v2570_v9  ;;  %2364 = vmatmul.mubr.msk.bf16.vlgmr.msra.gmra.mrb[12].mxu1 %vm1179_vm4, %v1423_v16  ;;  %v2557_v16 = vld [vmem:[%s3444_s23 + $0x10] sm:$0xff]   ;;  %v2558_v17 = vld [vmem:[%s3444_s23 + $0x18] sm:$0xff]  }
 0x801   : > { %2377 = vmatprep.mubr.msk.bf16.mxu1 %vm2965_vm1, %v2964_v31  ;;  %2374 = vmatpush3.bf16.msra.mxu1 %v2551_v19 }
 0x802   : > { %v1424_v41 = vpack.c.bf16 %v1422_v18, %v1422_v18  ;;  %2375 = vmatprep.subr.bf16.mxu1 %v2964_v31  ;;  %v2259_v18 = vld [vmem:[%s3779_s24] ss:$0 sm:$0xff] }
 0x804   : > { %2370 = vmatmul.mubr.msk.bf16.vlgmr.msra.gmra.mrb[16].mxu0 %vm1179_vm4, %v1424_v41 }
 0x805   : > { %2385 = vmatprep.mubr.msk.bf16.mxu0 %vm2965_vm1, %v2964_v31  ;;  %2376 = vmatpush3.bf16.msra.mxu1 %v2552_v20 }
 0x806   : > { %2389 = vmatprep.subr.bf16.mxu1 %v2964_v31 }
 0x8d3   : > { %v1467_v21 = vpop.f32.mrb[12].mxu1 }
 0x8d4   : > { %v2365_v22 = vpop.f32.mrb[13].mxu1 }
 0x8d5   : > { %v1470_v23 = vpop.f32.mrb[14].mxu1 }
 0x8d6   : > { %v2366_v24 = vpop.f32.mrb[15].mxu1 }
 0x8d7   : > { %v1515_v25 = vpop.f32.mrb[16].mxu0 }
 0x8d8   : > { %v2544_v26 = vpack.i.bf16 %v1515_v25, %v1467_v21  ;;  %v2371_v27 = vpop.f32.mrb[17].mxu0 }
 0x8d9   : > { %v1518_v28 = vpop.f32.mrb[18].mxu0 }
 0x8da   : > { %2545 = vrot.lane.b32.xlu1 %v2544_v26, %s2972_s30  ;;  %v2372_v29 = vpop.f32.mrb[19].mxu0 }
 0x94c   : > { %v2546_v30 = vpop.permute.xlu1 %2545 }
 0x94d   : > { %v2548_v32 = vunpack.i.h.bf16 %v2546_v30  ;;  %v2547_v35 = vunpack.i.l.bf16 %v2546_v30 }
 0x94f   : > { %v1530_v36 = vsel %vm1083_vm3, %v3542_v47, %v2548_v32  ;;  %v1529_v37 = vsel %vm1083_vm3, %v3540_v42, %v2547_v35 }
 0x950   : > { %v1531_v38 = vpack.c.bf16 %v1530_v36, %v1529_v37 }
 0x952   : > { %2378 = vmatmul.mubr.msk.bf16.vlgmr.msra.gmra.mrb[16].mxu1 %vm999_vm2, %v1531_v38 }
 0x953   : > { %2397 = vmatprep.mubr.msk.bf16.mxu1 %vm2965_vm1, %v2964_v31  ;;  %2390 = vmatpush3.bf16.msra.mxu1 %v2555_v14 }
 0x954   : > { %2391 = vmatprep.subr.bf16.mxu1 %v2964_v31 }
 0x957   : > { %2392 = vmatpush3.bf16.msra.mxu1 %v2556_v15 }
 0x958   : > { %2393 = vmatprep.subr.bf16.mxu1 %v2964_v31 }
 0x95b   : > { %2394 = vmatpush3.bf16.msra.mxu1 %v2557_v16 }
 0x95c   : > { %2395 = vmatprep.subr.bf16.mxu1 %v2964_v31 }
 0x95f   : > { %2396 = vmatpush3.bf16.msra.mxu1 %v2558_v17  ;;  %v2587_v17 = vld [vmem:[%s3783_s3] sm:$0xff] (!%p2271_p5)  }
 0xa25   : > { %v1592_v40 = vpop.f32.mrb[16].mxu1 }
 0xa26   : > { %v1593_v43 = vadd.f32 %v2253_v39, %v1592_v40  ;;  %v2379_v45 = vpop.f32.mrb[17].mxu1 }
 0xa27   : > { %v1595_v46 = vpop.f32.mrb[18].mxu1 }
 0xa28   : > { %v1596_v48 = vadd.f32 %v2253_v39, %v1595_v46  ;;  %v2380_v49 = vpop.f32.mrb[19].mxu1  ;;  %v1599_v50 = vadd.f32 %v1593_v43, %v3471_v33 }
 0xa29   : > { %v2263_v49 = vld [vmem:[%s798_s21] ss:$0 sm:$0xff] }
 0xa2a   : > { %v1603_v47 = vsel %vm999_vm2, %v1599_v50, 0.0  ;;  %v1600_v42 = vadd.f32 %v1596_v48, %v3473_v34  ;;  %v2553_v34 = vld [vmem:[%s3439_s22] sm:$0xff]  }
 0xa2b   : > { %1604 = vadd.xlane.f32.xlu1 %v1603_v47  ;;  %2382 = vmatpush3.bf16.msra.mxu0 %v2553_v34 }
 0xa2c   : > { %v1606_v51 = vsel %vm999_vm2, %v1600_v42, 0.0  ;;  %2383 = vmatprep.subr.bf16.mxu0 %v2964_v31 }
 0xa2d   : > { %1607 = vadd.xlane.f32.xlu0 %v1606_v51 }
 0xa2f   : > { %2384 = vmatpush3.bf16.msra.mxu0 %v2554_v62 }
 0xab8   : > { %v1605_v52 = vpop.xlane.xlu1 %1604 }
 0xab9   : > { %v1610_v53 = vmul.f32 0.03125, %v1605_v52 }
 0xaba   : > { %v1608_v54 = vpop.xlane.xlu0 %1607 }
 0xabb   : > { %v1612_v55 = vsub.f32 %v1599_v50, %v1610_v53  ;;  %v1611_v56 = vmul.f32 0.03125, %v1608_v54 }
 0xabd   : > { %v1613_v57 = vsub.f32 %v1600_v42, %v1611_v56  ;;  %v1614_v58 = vmul.f32 %v1612_v55, %v1612_v55 }
 0xabf   : > { %v1616_v60 = vsel %vm999_vm2, %v1614_v58, 0.0  ;;  %v1615_v33 = vmul.f32 %v1613_v57, %v1613_v57 }
 0xac0   : > { %1617 = vadd.xlane.f32.xlu0 %v1616_v60 }
 0xac1   : > { %v1619_v61 = vsel %vm999_vm2, %v1615_v33, 0.0 }
 0xac2   : > { %1620 = vadd.xlane.f32.xlu1 %v1619_v61 }
 0xb4d   : > { %v1618_v63 = vpop.xlane.xlu0 %1617 }
 0xb4e   : > { %v1622_v1 = vmul.f32 0.03125, %v1618_v63 }
 0xb4f   : > { %v1621_v59 = vpop.xlane.xlu1 %1620 }
 0xb50   : > { %v1624_v2 = vadd.f32 1e-05, %v1622_v1  ;;  %v1623_v3 = vmul.f32 0.03125, %v1621_v59 }
 0xb52   : > { %2575 = vrsqrt.f32 %v1624_v2  ;;  %v1625_v4 = vadd.f32 1e-05, %v1623_v3 }
 0xb54   : > { %2577 = vrsqrt.f32 %v1625_v4 }
 0xb5c   : > { %v2576_v5 = vpop.eup %2575 }
 0xb5d   : > { %v1628_v0 = vmul.f32 %v2576_v5, %v1612_v55 }
 0xb5e   : > { %v2578_v7 = vpop.eup %2577 }
 0xb5f   : > { %v1636_v8 = vmul.f32 %v2257_v6, %v1628_v0  ;;  %v1629_v9 = vmul.f32 %v2578_v7, %v1613_v57 }
 0xb61   : > { %v1637_v10 = vmul.f32 %v2257_v6, %v1629_v9  ;;  %v1644_v11 = vadd.f32 %v2258_v44, %v1636_v8  ;;  %v2269_v9 = vld [vmem:[%s914_s20] ss:$0 sm:$0xff] }
 0xb63   : > { %v1645_v12 = vadd.f32 %v2258_v44, %v1637_v10 }
 0xb65   : > { %v1646_v13 = vpack.c.bf16 %v1645_v12, %v1644_v11 }
 0xb67   : > { %2386 = vmatmul.mubr.msk.bf16.vlgmr.msra.gmra.mrb[20].mxu0 %vm999_vm2, %v1646_v13 }
 0xc3a   : > { %v1707_v41 = vpop.f32.mrb[20].mxu0 }
 0xc3b   : > { %v1708_v19 = vadd.f32 %v2259_v18, %v1707_v41  ;;  %v2387_v20 = vpop.f32.mrb[21].mxu0 }
 0xc3c   : > { %v1710_v21 = vpop.f32.mrb[22].mxu0  ;;  %v2588_v20 = vld [vmem:[%s3783_s3 + $0x8] sm:$0xff] (!%p2271_p5)  }
 0xc3d   : > { %v1714_v22 = vmul.f32 %v1708_v19, %v1708_v19  ;;  %v1711_v23 = vadd.f32 %v2259_v18, %v1710_v21  ;;  %v2388_v24 = vpop.f32.mrb[23].mxu0 }
 0xc3f   : > { %v1716_v25 = vmul.f32 %v1714_v22, %v1708_v19  ;;  %v1715_v26 = vmul.f32 %v1711_v23, %v1711_v23 }
 0xc41   : > { %v1718_v27 = vmul.f32 0.044715, %v1716_v25  ;;  %v1717_v28 = vmul.f32 %v1715_v26, %v1711_v23  ;;  %v2272_v26 = vld [vmem:[%s3784_s18] ss:$0 sm:$0xff] (!%p2271_p5) }
 0xc43   : > { %v1720_v29 = vadd.f32 %v1718_v27, %v1708_v19  ;;  %v1719_v30 = vmul.f32 0.044715, %v1717_v28 }
 0xc45   : > { %v1722_v32 = vmul.f32 0.7978846, %v1720_v29  ;;  %v1721_v31 = vadd.f32 %v1719_v30, %v1711_v23 }
 0xc47   : > { %2579 = vtanh.f32 %v1722_v32  ;;  %v1723_v35 = vmul.f32 0.7978846, %v1721_v31 }
 0xc49   : > { %2581 = vtanh.f32 %v1723_v35 }
 0xc51   : > { %v2580_v36 = vpop.eup %2579 }
 0xc52   : > { %v1726_v37 = vadd.f32 1.0, %v2580_v36 }
 0xc53   : > { %v2582_v38 = vpop.eup %2581 }
 0xc54   : > { %v1728_v39 = vmul.f32 0.5, %v1726_v37  ;;  %v1727_v40 = vadd.f32 1.0, %v2582_v38 }
 0xc56   : > { %v1729_v43 = vmul.f32 0.5, %v1727_v40  ;;  %v1730_v45 = vmul.f32 %v1728_v39, %v1708_v19  ;;  %v2973_v19 = vmov (!%p2271_p5), 0.0  }
 0xc57   : > { %2401 = vmatprep.subr.bf16.mxu0 (!%p2271_p5), %v2973_v19  ;;  %2405 = vmatprep.mubr.msk.bf16.mxu0 (!%p2271_p5), %vm2974_vm7, %v2973_v19 }
 0xc58   : > { %v1731_v46 = vmul.f32 %v1729_v43, %v1711_v23  ;;  %2402 = vmatpush3.bf16.msra.mxu0 (!%p2271_p5), %v2587_v17 }
 0xc59   : > { %2403 = vmatprep.subr.bf16.mxu0 (!%p2271_p5), %v2973_v19 }
 0xc5a   : > { %v1732_v48 = vpack.c.bf16 %v1731_v46, %v1730_v45 }
 0xc5c   : > { %2398 = vmatmul.mubr.msk.bf16.vlgmr.msra.gmra.mrb[20].mxu1 %vm1772_vm6, %v1732_v48  ;;  %2404 = vmatpush3.bf16.msra.mxu0 (!%p2271_p5), %v2588_v20 }
 0xd2f   : > { %v1810_v50 = vpop.f32.mrb[20].mxu1 }
 0xd30   : > { %v1811_v47 = vadd.f32 %v2263_v49, %v1810_v50  ;;  %v2399_v42 = vpop.f32.mrb[21].mxu1 }
 0xd31   : > { %v1813_v51 = vpop.f32.mrb[22].mxu1 }
 0xd32   : > { %v1814_v52 = vadd.f32 %v2263_v49, %v1813_v51  ;;  %v2400_v53 = vpop.f32.mrb[23].mxu1  ;;  %v1817_v54 = vadd.f32 %v1811_v47, %v1644_v11  ;;  %v2270_v11 = vld [vmem:[%s917_s15] ss:$0 sm:$0xff] }
 0xd34   : > { %v1821_v55 = vsel %vm999_vm2, %v1817_v54, 0.0  ;;  %v1818_v56 = vadd.f32 %v1814_v52, %v1645_v12 }
 0xd35   : > { %1822 = vadd.xlane.f32.xlu0 %v1821_v55 }
 0xd36   : > { %v1824_v57 = vsel %vm999_vm2, %v1818_v56, 0.0 }
 0xd37   : > { %1825 = vadd.xlane.f32.xlu1 %v1824_v57 }
 0xdc2   : > { %v1823_v58 = vpop.xlane.xlu0 %1822 }
 0xdc3   : > { %v1827_v60 = vmul.f32 0.03125, %v1823_v58 }
 0xdc4   : > { %v1826_v33 = vpop.xlane.xlu1 %1825 }
 0xdc5   : > { %v1829_v61 = vsub.f32 %v1817_v54, %v1827_v60  ;;  %v1828_v34 = vmul.f32 0.03125, %v1826_v33 }
 0xdc7   : > { %v1830_v62 = vsub.f32 %v1818_v56, %v1828_v34  ;;  %v1831_v63 = vmul.f32 %v1829_v61, %v1829_v61 }
 0xdc9   : > { %v1833_v1 = vsel %vm999_vm2, %v1831_v63, 0.0  ;;  %v1832_v59 = vmul.f32 %v1830_v62, %v1830_v62 }
 0xdca   : > { %1834 = vadd.xlane.f32.xlu0 %v1833_v1 }
 0xdcb   : > { %v1836_v2 = vsel %vm999_vm2, %v1832_v59, 0.0 }
 0xdcc   : > { %1837 = vadd.xlane.f32.xlu1 %v1836_v2 }
 0xe57   : > { %v1835_v3 = vpop.xlane.xlu0 %1834 }
 0xe58   : > { %v1839_v4 = vmul.f32 0.03125, %v1835_v3 }
 0xe59   : > { %v1838_v5 = vpop.xlane.xlu1 %1837 }
 0xe5a   : > { %v1841_v6 = vadd.f32 1e-05, %v1839_v4  ;;  %v1840_v0 = vmul.f32 0.03125, %v1838_v5 }
 0xe5c   : > { %2583 = vrsqrt.f32 %v1841_v6  ;;  %v1842_v7 = vadd.f32 1e-05, %v1840_v0 }
 0xe5e   : > { %2585 = vrsqrt.f32 %v1842_v7 }
 0xe66   : > { %v2584_v8 = vpop.eup %2583 }
 0xe67   : > { %v1845_v44 = vmul.f32 %v2584_v8, %v1829_v61 }
 0xe68   : > { %v2586_v10 = vpop.eup %2585 }
 0xe69   : > { %v1853_v12 = vmul.f32 %v2269_v9, %v1845_v44  ;;  %v1846_v13 = vmul.f32 %v2586_v10, %v1830_v62  ;;  %1868 = sbr.rel (%p2271_p5) target bundleno = 4079 (0xfef), region = 136 }
 0xe6b   : > { %v1861_v14 = vadd.f32 %v2270_v11, %v1853_v12  ;;  %v1854_v15 = vmul.f32 %v2269_v9, %v1846_v13 }
 0xe6d   : > { %1863 = vst.msk [vmem:[#allocation2] sm:$0xff] %vm999_vm2, %v1861_v14  ;;  %v1862_v16 = vadd.f32 %v2270_v11, %v1854_v15  ;;  %v1869_v18 = vpack.c.bf16 (!%p2271_p5), %v1861_v14, %v1861_v14 }
 0xe6f   : > { %1864 = vst.msk [vmem:[#allocation2 + $0x8] sm:$0xff] %vm999_vm2, %v1862_v16  ;;  %v1870_v41 = vpack.c.bf16 (!%p2271_p5), %v1862_v16, %v1862_v16  ;;  %v1884_v21 = vunpack.c.l.b16 (!%p2271_p5), %v1869_v18 }
 0xe71   : > { %v1885_v22 = vunpack.c.l.b16 %v1870_v41 }
 0xe73   : > { %v1886_v23 = vrot.slane %v1885_v22, 7 }
 0xe75   : > { %v1888_v24 = vsel %vm1887_vm8, %v1886_v23, %v1884_v21 }
 0xe76   : > { %v1889_v25 = vpack.c.b16 %v1888_v24, %v1888_v24 }
 0xe78   : > { %2406 = vmatmul.mubr.msk.bf16.vlgmr.msra.gmra.mrb[0].mxu0 %vm999_vm2, %v1889_v25 }
 0xf4b   : > { %v1939_v27 = vpop.f32.mrb[0].mxu0 }
 0xf4c   : > { %v1940_v28 = vadd.f32 %v2272_v26, %v1939_v27  ;;  %v2407_v29 = vpop.f32.mrb[1].mxu0 }
 0xf4d   : > { %v1942_v30 = vpop.f32.mrb[2].mxu0 }
 0xf4e   : > { %v2408_v32 = vpop.f32.mrb[3].mxu0  ;;  %v1945_v31 = vmul.f32 %v1940_v28, %v1940_v28 }
 0xf50   : > { %v1947_v35 = vsel %vm1946_vm9, %v1945_v31, 0.0 }
 0xf51   : > { %1948 = vadd.xlane.f32.xlu0 %v1947_v35 }
 0xfde   : > { %v1949_v36 = vpop.xlane.xlu0 %1948 }
 0xfdf   : > { %v1950_v37 = vmax.f32 %v1949_v36, 1e-24 }
 0xfe1   : > { %2589 = vrsqrt.f32 %v1950_v37 }
 0xfeb   : > { %v2590_v38 = vpop.eup %2589 }
 0xfec   : > { %v1952_v39 = vmul.f32 %v2590_v38, %v1940_v28 }
 0xfee   : > { %1953 = vst [vmem:[#allocation18] sm:$0x3] %v1952_v39 }
 0xfef PF: > { %p2473_p0 = scmp.eq.s32.totalorder %s3100_s1, 1  ;;  %s2975_s29 = smov [#allocation18]  }
 0xff0   : > { %s1963_s2 = sshll.u32 %s2975_s29, 4  ;;  %s1964_s2 = int_to_ptr.vmem [resolvable:$true] %s1963_s2 }
 0xff1   : > { %s2855_s17 = scalar_lea.vmem %s1964_s2, 32  ;;  %p2862_p8 = scmp.lt.s32.totalorder %s1964_s2, %s1964_s2 }
 0xff2   : > { %p2856_p2 = scmp.ne.s32.totalorder %s1964_s2, %s2855_s17  ;;  %p2863_p7 = scmp.lt.s32.totalorder %s2855_s17, %s2855_s17 }
 0xff4   : > { %p2857_p10 = pnand %p2856_p2, %p2473_p0  ;;  %p2864_p9 = por %p2863_p7, %p2862_p8 }
 0xff6   : > { %p2858_p3 = pneg %p2857_p10 }
 0xff8   : > { %p2865_p6 = pnand %p2864_p9, %p2858_p3 }
 0xffa   : > { %2868 = shalt.err (!%p2865_p6)
}
 0xffb   : > { %s3785_s30 = sld [smem:[#allocation46_spill]] }
0x1001   : > { %s3786_s6 = smov %s3785_s30  ;;  %s2869_s12 = scalar_lea.hbm %s3785_s30, 32 }
0x1002   : > { %p2870_p12 = scmp.ne.s32.totalorder %s3786_s6, %s2869_s12  ;;  %p2875_p4 = scmp.lt.u32.totalorder %s2869_s12, %s3786_s6 }
0x1004   : > { %p2871_p11 = pnand %p2870_p12, %p2473_p0 }
0x1006   : > { %p2872_p13 = pneg %p2871_p11 }
0x1008   : > { %p2877_p1 = pnand %p2875_p4, %p2872_p13 }
0x100a   : > { %2880 = shalt.err (!%p2877_p1)
}
0x100b   : > { %2434 = dma.vmem_to_hbm [thread:$0]  (%p2473_p0), %s1964_s2, 32, %s3786_s6, [#allocation5]  }
0x100c   : > { %2926 = dma.done.wait (%p2473_p0), [#allocation5], 32  }
0x100d   : > { %2928 = vsyncadd (%p2473_p0), [#allocation5], 4294967264 }
0x100e PF: > { %s3787_s8 = sld [smem:[#allocation28_spill]]  ;;  %s3788_s0 = sld [smem:[#allocation25_spill]] }
0x100f   : > { %s3789_s29 = sld [smem:[#allocation30_spill]]  ;;  %s3790_s30 = sld [smem:[#allocation27_spill]] }
0x1010   : > { %s3791_s5 = sld [smem:[#allocation29_spill]]  ;;  %s3792_s27 = smov %s2935_s28 }
0x1014   : > { %s40_s19 = sadd.s32 1, %s3787_s8   ;;  %s3793_s28 = smov %s3788_s0 }
0x1015   : > { %p37_p5 = scmp.ge.s32.totalorder %s40_s19, 4  }
0x1016   : > { %s3794_s0 = smov %s3791_s5 }
0x1017   :  { %39 = sbr.rel (!%p37_p5) target bundleno = 28 (0x1c), region = 230 }
0x101e   :  { %1976 = vsyncpa [#allocation4], 1 }
0x101f   :  { %1978 = vsyncpa [#allocation4 + $0x1], 1 }
0x1020   :  { %1979 = vsyncpa [#allocation7], 1 }
0x1021   :  { %1980 = vsyncpa [#allocation10], 1 }
0x1022   :  { %1982 = vsyncpa [#allocation10 + $0x1], 1 }
0x1023   :  { %1983 = vsyncpa [#allocation13], 1 }
0x1024   :  { %1985 = vsyncpa [#allocation13 + $0x1], 1 }
0x1025   :  { %1986 = vsyncpa [#allocation16], 1 }
0x1026   :  { %1988 = vsyncpa [#allocation16 + $0x1], 1 }
0x1027   :  { %1989 = vsyncpa [#allocation5], 1 }
0x1028   :  { %1991 = vsyncpa [#allocation5 + $0x1], 1 }

</bundles_post_ra>
